<compile_context>
chip_gen: v6e
topology: v6e:2x2x1
jax: 0.10.0
libtpu: 0.0.40
codegen_flags: <defaults>
</compile_context>

<pallas_src>
import jax
import jax.numpy as jnp
from jax.experimental import pallas as pl
from jax.experimental.pallas import tpu as pltpu


def mlp_kernel(x_ref, w1_ref, b1_ref, w2_ref, b2_ref, o_ref):
    # Layer 1: bf16 MXU operands, f32 accumulation.  X arrives f32 and is cast
    # in-register (cheap VPU op, avoids a separate XLA cast kernel).
    x_bf = x_ref[...].astype(jnp.bfloat16)
    h = jnp.dot(x_bf, w1_ref[...], preferred_element_type=jnp.float32)
    # Bias + ReLU(inplace=True) semantics, all in f32.
    h = jnp.maximum(h + b1_ref[...], 0.0)
    # Output layer (tiny f32 matmul) + bias.
    logits = jnp.dot(h, w2_ref[...],
                     preferred_element_type=jnp.float32) + b2_ref[...]
    # Softmax over the last dim (nn.Softmax() applied to 2-D input -> dim=1).
    m = jnp.max(logits, axis=-1, keepdims=True)
    e = jnp.exp(logits - m)
    o_ref[...] = e / jnp.sum(e, axis=-1, keepdims=True)


def mlp_forward(x, w1_bf, b1, w2, b2, *, tb=256):
    """Forward pass.  `w1_bf` must be the cached bf16 copy of W1 (see
    prepare_inference_params); everything else stays f32."""
    B, F = x.shape
    H = w1_bf.shape[1]
    O = w2.shape[1]
    assert w1_bf.shape == (F, H) and w1_bf.dtype == jnp.bfloat16
    assert b1.shape == (1, H) and w2.shape == (H, O) and b2.shape == (1, O)
    # TODO(synk): for much larger F (bf16 W1 >> a few MB) re-introduce a K-tiled
    # reduction grid; at the module's shapes a single full-F block is optimal.

    # Batch tiling: full batch when small, 256-row tiles (multiple of 16, bf16
    # sublane-safe) when large so the 'parallel' axis can span both v7x TCs.
    if B <= tb:
        TB = B
    else:
        assert B % tb == 0, "large batch must be a multiple of the batch tile"
        TB = tb
    nb = B // TB

    return pl.pallas_call(
        mlp_kernel,
        out_shape=jax.ShapeDtypeStruct((B, O), jnp.float32),
        grid=(nb,),
        in_specs=[
            pl.BlockSpec((TB, F), lambda b: (b, 0)),   # X tile (f32, cast in-kernel)
            pl.BlockSpec((F, H),  lambda b: (0, 0)),   # W1 (bf16, single block)
            pl.BlockSpec((1, H),  lambda b: (0, 0)),   # b1
            pl.BlockSpec((H, O),  lambda b: (0, 0)),   # W2
            pl.BlockSpec((1, O),  lambda b: (0, 0)),   # b2
        ],
        out_specs=pl.BlockSpec((TB, O), lambda b: (b, 0)),
        compiler_params=pltpu.CompilerParams(
            dimension_semantics=("parallel",),
            vmem_limit_bytes=16 << 20,   # working set ~3 MiB incl. double-buffer
        ),
    )(x, w1_bf, b1, w2, b2)


def init_params(key, input_features, hidden, output_features):
    # Matches Model.init_params with init_weight='he' (kaiming_normal_,
    # fan_in mode, gain=sqrt(2)) and init_bias='zero'.
    k1, k2 = jax.random.split(key)
    std1 = (2.0 / input_features) ** 0.5   # fan_in of Linear(F, H) weight
    std2 = (2.0 / hidden) ** 0.5           # fan_in of Linear(H, O) weight
    w1 = std1 * jax.random.normal(k1, (input_features, hidden), jnp.float32)
    b1 = jnp.zeros((1, hidden), jnp.float32)
    w2 = std2 * jax.random.normal(k2, (hidden, output_features), jnp.float32)
    b2 = jnp.zeros((1, output_features), jnp.float32)
    return w1, b1, w2, b2


def prepare_inference_params(w1, b1, w2, b2):
    """One-time preprocessing: cache a bf16 copy of W1 so the per-call wrapper
    never re-reads / re-casts the f32 weight."""
    return w1.astype(jnp.bfloat16), b1, w2, b2


if __name__ == "__main__":
    # Shapes consistent with the module's forward: X is (batch, features).
    batch = 8
    input_features = 28 * 28 * 3   # = 2352, module default
    hidden = 256                   # linear=[256] default
    output_features = 10

    key = jax.random.PRNGKey(0)
    kx, kp = jax.random.split(key)
    x = jax.random.normal(kx, (batch, input_features), jnp.float32)
    w1, b1, w2, b2 = init_params(kp, input_features, hidden, output_features)

    # Cached (param-init-time) bf16 weight -- done once, outside the hot path.
    w1_bf, b1_c, w2_c, b2_c = prepare_inference_params(w1, b1, w2, b2)
    w1_bf, b1_c, w2_c, b2_c = jax.block_until_ready((w1_bf, b1_c, w2_c, b2_c))

    out = jax.block_until_ready(mlp_forward(x, w1_bf, b1_c, w2_c, b2_c))

    # Pure-JAX f32 reference (tolerance accounts for bf16 layer-1 operands).
    h_ref = jnp.maximum(x @ w1 + b1, 0.0)
    ref = jax.nn.softmax(h_ref @ w2 + b2, axis=-1)

    assert out.shape == (batch, output_features)
    assert bool(jnp.all(jnp.isfinite(out)))
    assert bool(jnp.all(jnp.abs(jnp.sum(out, axis=-1) - 1.0) < 1e-3))
    assert bool(jnp.max(jnp.abs(out - ref)) < 5e-2)

    print("KERNEL_OK")
</pallas_src>

<mosaic_0001>
module attributes {stable_mosaic.version = 11 : i64} {
  func.func @mlp_kernel(%arg0: i32, %arg1: memref<8x2352xf32, #tpu.memory_space<vmem>>, %arg2: memref<2352x256xbf16, #tpu.memory_space<vmem>>, %arg3: memref<1x256xf32, #tpu.memory_space<vmem>>, %arg4: memref<256x10xf32, #tpu.memory_space<vmem>>, %arg5: memref<1x10xf32, #tpu.memory_space<vmem>>, %arg6: memref<8x10xf32, #tpu.memory_space<vmem>>) attributes {dimension_semantics = [#tpu.dimension_semantics<parallel>], iteration_bounds = array<i64: 1>, scalar_prefetch = 0 : i64, scratch_operands = 0 : i64, tpu.core_type = #tpu.core_type<tc>, window_params = [{transform_indices = @transform_0, window_bounds = array<i64: 8, 2352>}, {pipeline_mode = #tpu.pipeline_mode<synchronous>, transform_indices = @transform_1, window_bounds = array<i64: 2352, 256>}, {pipeline_mode = #tpu.pipeline_mode<synchronous>, transform_indices = @transform_2, window_bounds = array<i64: 1, 256>}, {pipeline_mode = #tpu.pipeline_mode<synchronous>, transform_indices = @transform_3, window_bounds = array<i64: 256, 10>}, {pipeline_mode = #tpu.pipeline_mode<synchronous>, transform_indices = @transform_4, window_bounds = array<i64: 1, 10>}, {transform_indices = @transform_5, window_bounds = array<i64: 8, 10>}]} {
    %c0 = arith.constant 0 : index
    %c0_0 = arith.constant 0 : index
    %0 = vector.load %arg1[%c0, %c0_0] : memref<8x2352xf32, #tpu.memory_space<vmem>>, vector<8x2352xf32>
    %1 = arith.truncf %0 : vector<8x2352xf32> to vector<8x2352xbf16>
    %c0_1 = arith.constant 0 : index
    %c0_2 = arith.constant 0 : index
    %2 = vector.load %arg2[%c0_1, %c0_2] : memref<2352x256xbf16, #tpu.memory_space<vmem>>, vector<2352x256xbf16>
    %cst = arith.constant dense<0.000000e+00> : vector<8x256xf32>
    %3 = tpu.matmul %1, %2, %cst {dimension_numbers = #tpu.dot_dimension_numbers<[1], [0], [0], [1], [0, 0, 1, 1], [], []>} : vector<8x2352xbf16>, vector<2352x256xbf16>, vector<8x256xf32> -> vector<8x256xf32>
    %c0_3 = arith.constant 0 : index
    %c0_4 = arith.constant 0 : index
    %4 = vector.load %arg3[%c0_3, %c0_4] : memref<1x256xf32, #tpu.memory_space<vmem>>, vector<1x256xf32>
    %5 = vector.broadcast %4 : vector<1x256xf32> to vector<8x256xf32>
    %6 = arith.addf %3, %5 : vector<8x256xf32>
    %cst_5 = arith.constant 0.000000e+00 : f32
    %7 = vector.broadcast %cst_5 : f32 to vector<8x256xf32>
    %8 = arith.maximumf %6, %7 : vector<8x256xf32>
    %c0_6 = arith.constant 0 : index
    %c0_7 = arith.constant 0 : index
    %9 = vector.load %arg4[%c0_6, %c0_7] : memref<256x10xf32, #tpu.memory_space<vmem>>, vector<256x10xf32>
    %cst_8 = arith.constant dense<0.000000e+00> : vector<8x10xf32>
    %10 = tpu.matmul %8, %9, %cst_8 {dimension_numbers = #tpu.dot_dimension_numbers<[1], [0], [0], [1], [0, 0, 1, 1], [], []>} : vector<8x256xf32>, vector<256x10xf32>, vector<8x10xf32> -> vector<8x10xf32>
    %c0_9 = arith.constant 0 : index
    %c0_10 = arith.constant 0 : index
    %11 = vector.load %arg5[%c0_9, %c0_10] : memref<1x10xf32, #tpu.memory_space<vmem>>, vector<1x10xf32>
    %12 = vector.broadcast %11 : vector<1x10xf32> to vector<8x10xf32>
    %13 = arith.addf %10, %12 : vector<8x10xf32>
    %cst_11 = arith.constant dense<0xFF800000> : vector<8xf32>
    %14 = vector.multi_reduction <maximumf>, %13, %cst_11 [1] : vector<8x10xf32> to vector<8xf32>
    %15 = vector.shape_cast %14 : vector<8xf32> to vector<8x1xf32>
    %16 = vector.broadcast %15 : vector<8x1xf32> to vector<8x10xf32>
    %17 = arith.subf %13, %16 : vector<8x10xf32>
    %18 = math.exp %17 : vector<8x10xf32>
    %cst_12 = arith.constant dense<0.000000e+00> : vector<8xf32>
    %19 = vector.multi_reduction <add>, %18, %cst_12 [1] : vector<8x10xf32> to vector<8xf32>
    %20 = vector.shape_cast %19 : vector<8xf32> to vector<8x1xf32>
    %21 = vector.broadcast %20 : vector<8x1xf32> to vector<8x10xf32>
    %22 = arith.divf %18, %21 : vector<8x10xf32>
    %c0_13 = arith.constant 0 : index
    %c0_14 = arith.constant 0 : index
    %23 = vector.load %arg6[%c0_13, %c0_14] : memref<8x10xf32, #tpu.memory_space<vmem>>, vector<8x10xf32>
    tpu.vector_store %arg6[%c0_13, %c0_14], %22 {strides = array<i32>} : memref<8x10xf32, #tpu.memory_space<vmem>>, vector<8x10xf32>,
    return
  }
  func.func @transform_0(%arg0: i32) -> (i32, i32) {
    %c0_i32 = arith.constant 0 : i32
    %c0_i32_0 = arith.constant 0 : i32
    return %arg0, %c0_i32 : i32, i32
  }
  func.func @transform_1(%arg0: i32) -> (i32, i32) {
    %c0_i32 = arith.constant 0 : i32
    %c0_i32_0 = arith.constant 0 : i32
    %c0_i32_1 = arith.constant 0 : i32
    return %c0_i32, %c0_i32_0 : i32, i32
  }
  func.func @transform_2(%arg0: i32) -> (i32, i32) {
    %c0_i32 = arith.constant 0 : i32
    %c0_i32_0 = arith.constant 0 : i32
    %c0_i32_1 = arith.constant 0 : i32
    return %c0_i32, %c0_i32_0 : i32, i32
  }
  func.func @transform_3(%arg0: i32) -> (i32, i32) {
    %c0_i32 = arith.constant 0 : i32
    %c0_i32_0 = arith.constant 0 : i32
    %c0_i32_1 = arith.constant 0 : i32
    return %c0_i32, %c0_i32_0 : i32, i32
  }
  func.func @transform_4(%arg0: i32) -> (i32, i32) {
    %c0_i32 = arith.constant 0 : i32
    %c0_i32_0 = arith.constant 0 : i32
    %c0_i32_1 = arith.constant 0 : i32
    return %c0_i32, %c0_i32_0 : i32, i32
  }
  func.func @transform_5(%arg0: i32) -> (i32, i32) {
    %c0_i32 = arith.constant 0 : i32
    %c0_i32_0 = arith.constant 0 : i32
    return %arg0, %c0_i32 : i32, i32
  }
}

</mosaic_0001>

<bundles_post_ra>
// kernel: tpu_custom_call.1
= control target key start
LH: loop header
LB: loop body
LE: loop exit
PB: predicated region body
PF: predicated region fallthrough
CT: control target
= control target key end

     0   :  { %10 = vsyncpa [#allocation3], 0  ;;  %s3490_s0 = inlined_call_operand.hbm [shape: f32[8,2352], index: 0, kind: input, shape index: {}]   ;;  %s3491_s1 = inlined_call_operand.hbm [shape: bf16[2352,256], index: 1, kind: input, shape index: {}]   ;;  %s3492_s2 = inlined_call_operand.hbm [shape: f32[1,256], index: 2, kind: input, shape index: {}]   ;;  %s3493_s3 = inlined_call_operand.vmem [shape: f32[256,10], index: 3, kind: input, shape index: {}]   ;;  %s3494_s4 = inlined_call_operand.hbm [shape: f32[1,10], index: 4, kind: input, shape index: {}]   ;;  %s3495_s5 = inlined_call_operand.hbm [shape: f32[8,10], index: 5, kind: output, shape index: {}]  }
   0x1   :  { %11 = vsyncpa [#allocation6], 0 }
   0x2   :  { %12 = vsyncpa [#allocation9], 0 }
   0x3   :  { %13 = vsyncpa [#allocation4], 0  ;;  %s3332_s18 = smov [#allocation5]  }
   0x4   :  { %s29_s19 = sshll.u32 %s3332_s18, 4  ;;  %s30_s19 = int_to_ptr.vmem [resolvable:$true] %s29_s19 }
   0x5   :  { %s3232_s20 = scalar_lea.vmem %s30_s19, 37632  ;;  %p3237_p1 = scmp.lt.s32.totalorder %s30_s19, %s30_s19 }
   0x6   :  { %p3233_p0 = scmp.ne.s32.totalorder %s30_s19, %s3232_s20  ;;  %p3238_p2 = scmp.lt.s32.totalorder %s3232_s20, %s3232_s20 }
   0x8   :  { %p3239_p3 = por %p3238_p2, %p3237_p1 }
   0xa   :  { %p3240_p4 = pnand %p3239_p3, %p3233_p0 }
   0xc   :  { %3243 = shalt.err (!%p3240_p4)
}
   0xd   :  { %s3333_s21 = smov 128   ;;  %s3334_s22 = smov 8  }
   0xe   :  { %35 = dma.hbm_to_vmem [thread:$0]  %s3491_s1, 37632, %s30_s19, [#allocation6], %s3333_s21, %s3333_s21, %s3334_s22  }
   0xf   :  { %s3335_s25 = smov [#allocation2]   ;;  %s3336_s27 = smov [#allocation7]  }
  0x10   :  { %s20_s26 = sshll.u32 %s3335_s25, 4  ;;  %s42_s28 = sshll.u32 %s3336_s27, 4  ;;  %s21_s26 = int_to_ptr.vmem [resolvable:$true] %s20_s26  ;;  %s43_s28 = int_to_ptr.vmem [resolvable:$true] %s42_s28 }
  0x11   :  { %s3252_s29 = scalar_lea.vmem %s21_s26, 2432  ;;  %p3257_p6 = scmp.lt.s32.totalorder %s21_s26, %s21_s26 }
  0x12   :  { %p3253_p5 = scmp.ne.s32.totalorder %s21_s26, %s3252_s29  ;;  %p3258_p7 = scmp.lt.s32.totalorder %s3252_s29, %s3252_s29 }
  0x14   :  { %p3259_p8 = por %p3258_p7, %p3257_p6 }
  0x16   :  { %p3260_p9 = pnand %p3259_p8, %p3253_p5 }
  0x18   :  { %3263 = shalt.err (!%p3260_p9)
}
  0x19   :  { %23 = dma.hbm_to_vmem [thread:$0]  %s3490_s0, 2432, %s21_s26, [#allocation3]  }
  0x1a   :  { %s3272_s7 = scalar_lea.vmem %s43_s28, 32  ;;  %p3277_p11 = scmp.lt.s32.totalorder %s43_s28, %s43_s28 }
  0x1b   :  { %p3273_p10 = scmp.ne.s32.totalorder %s43_s28, %s3272_s7  ;;  %p3278_p12 = scmp.lt.s32.totalorder %s3272_s7, %s3272_s7 }
  0x1d   :  { %p3279_p13 = por %p3278_p12, %p3277_p11 }
  0x1f   :  { %p3280_p0 = pnand %p3279_p13, %p3273_p10 }
  0x21   :  { %3283 = shalt.err (!%p3280_p0)
}
  0x22   :  { %45 = dma.hbm_to_vmem [thread:$0]  %s3492_s2, 32, %s43_s28, [#allocation6]  }
  0x23   :  { %s3337_s9 = smov [#allocation8]  }
  0x24   :  { %s54_s10 = sshll.u32 %s3337_s9, 4  ;;  %s55_s10 = int_to_ptr.vmem [resolvable:$true] %s54_s10 }
  0x25   :  { %s3292_s11 = scalar_lea.vmem %s55_s10, 16  ;;  %s3296_s12 = scalar_lea.vmem %s55_s10, 32 }
  0x26   :  { %p3293_p1 = scmp.ne.s32.totalorder %s55_s10, %s3292_s11  ;;  %p3297_p2 = scmp.lt.s32.totalorder %s55_s10, %s55_s10 }
  0x27   :  { %p3298_p3 = scmp.lt.s32.totalorder %s3296_s12, %s3292_s11 }
  0x29   :  { %p3299_p4 = por %p3298_p3, %p3297_p2 }
  0x2b   :  { %p3300_p5 = pnand %p3299_p4, %p3293_p1 }
  0x2d   :  { %3303 = shalt.err (!%p3300_p5)
}
  0x2e   :  { %57 = dma.hbm_to_vmem [thread:$0]  %s3494_s4, 16, %s55_s10, [#allocation9]  }
  0x2f   :  { %3324 = dma.done.wait [#allocation3], 2432  }
  0x30   :  { %3325 = vsyncadd [#allocation3], 4294964864 }
  0x31   :  { %3326 = dma.done.wait [#allocation6], 37664  }
  0x32   :  { %3327 = vsyncadd [#allocation6], 4294929632 }
  0x33   :  { %3328 = dma.done.wait [#allocation9], 16  }
  0x34   :  { %3329 = vsyncadd [#allocation9], 4294967280  ;;  %v2779_v0 = vld [vmem:[#allocation5 + $0x74] ss:$8 sps:$4 sm:$0xff]   ;;  %v2781_v1 = vld [vmem:[#allocation5 + $0x70] ss:$8 sps:$4 sm:$0xff]  }
  0x35   :  { %1889 = vmatprep.subr.bf16.mxu0 %v2779_v0  ;;  %v2782_v2 = vld [vmem:[#allocation5 + $0x174] ss:$8 sps:$4 sm:$0xff]   ;;  %v2784_v3 = vld [vmem:[#allocation5 + $0x170] ss:$8 sps:$4 sm:$0xff]   ;;  %v2785_v4 = vld [vmem:[#allocation5 + $0x64] ss:$8 sps:$4 sm:$0xff]  }
  0x36   :  { %1890 = vmatpush1.bf16.msra.mxu0 %v2781_v1  ;;  %v2787_v5 = vld [vmem:[#allocation5 + $0x60] ss:$8 sps:$4 sm:$0xff]   ;;  %1930 = vmatprep.subr.bf16.mxu1 %v2782_v2  ;;  %v2788_v6 = vld [vmem:[#allocation5 + $0x164] ss:$8 sps:$4 sm:$0xff]   ;;  %v2791_v8 = vld [vmem:[#allocation5 + $0x54] ss:$8 sps:$4 sm:$0xff]  }
  0x37   :  { %1931 = vmatpush1.bf16.msra.mxu1 %v2784_v3  ;;  %1891 = vmatprep.subr.bf16.mxu0 %v2785_v4  ;;  %v2790_v7 = vld [vmem:[#allocation5 + $0x160] ss:$8 sps:$4 sm:$0xff]   ;;  %v2793_v9 = vld [vmem:[#allocation5 + $0x50] ss:$8 sps:$4 sm:$0xff]   ;;  %v2794_v10 = vld [vmem:[#allocation5 + $0x154] ss:$8 sps:$4 sm:$0xff]  }
  0x38   :  { %1932 = vmatprep.subr.bf16.mxu1 %v2788_v6  ;;  %v2797_v11 = vld [vmem:[#allocation5 + $0x44] ss:$8 sps:$4 sm:$0xff]   ;;  %v2796_v12 = vld [vmem:[#allocation5 + $0x150] ss:$8 sps:$4 sm:$0xff]   ;;  %v2799_v14 = vld [vmem:[#allocation5 + $0x40] ss:$8 sps:$4 sm:$0xff]  }
  0x39   :  { %v2800_v13 = vld [vmem:[#allocation5 + $0x144] ss:$8 sps:$4 sm:$0xff]   ;;  %v2803_v15 = vld [vmem:[#allocation5 + $0x34] ss:$8 sps:$4 sm:$0xff]   ;;  %v2802_v16 = vld [vmem:[#allocation5 + $0x140] ss:$8 sps:$4 sm:$0xff]  }
  0x3a   :  { %1892 = vmatpush1.bf16.msra.mxu0 %v2787_v5  ;;  %v2806_v17 = vld [vmem:[#allocation5 + $0x134] ss:$8 sps:$4 sm:$0xff]   ;;  %v2805_v18 = vld [vmem:[#allocation5 + $0x30] ss:$8 sps:$4 sm:$0xff]   ;;  %v2809_v19 = vld [vmem:[#allocation5 + $0x24] ss:$8 sps:$4 sm:$0xff]  }
  0x3b   :  { %1893 = vmatprep.subr.bf16.mxu0 %v2791_v8  ;;  %1933 = vmatpush1.bf16.msra.mxu1 %v2790_v7  ;;  %v2808_v20 = vld [vmem:[#allocation5 + $0x130] ss:$8 sps:$4 sm:$0xff]   ;;  %v2812_v21 = vld [vmem:[#allocation5 + $0x124] ss:$8 sps:$4 sm:$0xff]   ;;  %v2811_v22 = vld [vmem:[#allocation5 + $0x20] ss:$8 sps:$4 sm:$0xff]  }
  0x3c   :  { %1934 = vmatprep.subr.bf16.mxu1 %v2794_v10  ;;  %v2815_v23 = vld [vmem:[#allocation5 + $0x14] ss:$8 sps:$4 sm:$0xff]   ;;  %v2814_v24 = vld [vmem:[#allocation5 + $0x120] ss:$8 sps:$4 sm:$0xff]   ;;  %v2817_v26 = vld [vmem:[#allocation5 + $0x10] ss:$8 sps:$4 sm:$0xff]  }
  0x3d   :  { %v2818_v25 = vld [vmem:[#allocation5 + $0x114] ss:$8 sps:$4 sm:$0xff]   ;;  %v2821_v27 = vld [vmem:[#allocation5 + $0x4] ss:$8 sps:$4 sm:$0xff]   ;;  %v2820_v28 = vld [vmem:[#allocation5 + $0x110] ss:$8 sps:$4 sm:$0xff]  }
  0x3e   :  { %1894 = vmatpush1.bf16.msra.mxu0 %v2793_v9  ;;  %v2824_v29 = vld [vmem:[#allocation5 + $0x104] ss:$8 sps:$4 sm:$0xff]   ;;  %v2823_v30 = vld [vmem:[#allocation5] ss:$8 sps:$4 sm:$0xff]   ;;  %v2827_v31 = vld [vmem:[#allocation5 + $0xf4] ss:$8 sps:$4 sm:$0xff]  }
  0x3f   :  { %1895 = vmatprep.subr.bf16.mxu0 %v2797_v11  ;;  %1935 = vmatpush1.bf16.msra.mxu1 %v2796_v12  ;;  %v2826_v32 = vld [vmem:[#allocation5 + $0x100] ss:$8 sps:$4 sm:$0xff]   ;;  %v2830_v33 = vld [vmem:[#allocation5 + $0x1f4] ss:$8 sps:$4 sm:$0xff]   ;;  %v2829_v34 = vld [vmem:[#allocation5 + $0xf0] ss:$8 sps:$4 sm:$0xff]  }
  0x40   :  { %1936 = vmatprep.subr.bf16.mxu1 %v2800_v13  ;;  %v2833_v35 = vld [vmem:[#allocation5 + $0xe4] ss:$8 sps:$4 sm:$0xff]   ;;  %v2832_v36 = vld [vmem:[#allocation5 + $0x1f0] ss:$8 sps:$4 sm:$0xff]   ;;  %v2835_v38 = vld [vmem:[#allocation5 + $0xe0] ss:$8 sps:$4 sm:$0xff]  }
  0x41   :  { %v2836_v37 = vld [vmem:[#allocation5 + $0x1e4] ss:$8 sps:$4 sm:$0xff]   ;;  %v2839_v39 = vld [vmem:[#allocation5 + $0xd4] ss:$8 sps:$4 sm:$0xff]   ;;  %v2838_v40 = vld [vmem:[#allocation5 + $0x1e0] ss:$8 sps:$4 sm:$0xff]  }
  0x42   :  { %1896 = vmatpush1.bf16.msra.mxu0 %v2799_v14  ;;  %v2842_v41 = vld [vmem:[#allocation5 + $0x1d4] ss:$8 sps:$4 sm:$0xff]   ;;  %v2841_v42 = vld [vmem:[#allocation5 + $0xd0] ss:$8 sps:$4 sm:$0xff]   ;;  %v2845_v43 = vld [vmem:[#allocation5 + $0xc4] ss:$8 sps:$4 sm:$0xff]  }
  0x43   :  { %1897 = vmatprep.subr.bf16.mxu0 %v2803_v15  ;;  %1937 = vmatpush1.bf16.msra.mxu1 %v2802_v16  ;;  %v2844_v44 = vld [vmem:[#allocation5 + $0x1d0] ss:$8 sps:$4 sm:$0xff]   ;;  %v2848_v45 = vld [vmem:[#allocation5 + $0x1c4] ss:$8 sps:$4 sm:$0xff]   ;;  %v2847_v47 = vld [vmem:[#allocation5 + $0xc0] ss:$8 sps:$4 sm:$0xff]  }
  0x44   :  { %1938 = vmatprep.subr.bf16.mxu1 %v2806_v17  ;;  %v72_v46 = vld [vmem:[#allocation2 + $0x8] sm:$0xff]  ;;  %v74_v50 = vld [vmem:[#allocation2 + $0x18] sm:$0xff]  ;;  %v71_v4 = vld [vmem:[#allocation2] sm:$0xff]  ;;  %vm1885_vm0 = vcmask 392192   ;;  %vm2410_vm1 = vcmask 80896  }
  0x45   :  { %v91_v48 = vpack.c.bf16 %v72_v46, %v72_v46  ;;  %v2851_v49 = vld [vmem:[#allocation5 + $0xb4] ss:$8 sps:$4 sm:$0xff]   ;;  %v2850_v51 = vld [vmem:[#allocation5 + $0x1c0] ss:$8 sps:$4 sm:$0xff]   ;;  %v93_v52 = vpack.c.bf16 %v74_v50, %v74_v50  ;;  %v2853_v54 = vld [vmem:[#allocation5 + $0xb0] ss:$8 sps:$4 sm:$0xff]   ;;  %v90_v7 = vpack.c.bf16 %v71_v4, %v71_v4 }
  0x46   :  { %1898 = vmatpush1.bf16.msra.mxu0 %v2805_v18  ;;  %v2854_v53 = vld [vmem:[#allocation5 + $0x1b4] ss:$8 sps:$4 sm:$0xff]   ;;  %v2857_v55 = vld [vmem:[#allocation5 + $0xa4] ss:$8 sps:$4 sm:$0xff]   ;;  %v2856_v56 = vld [vmem:[#allocation5 + $0x1b0] ss:$8 sps:$4 sm:$0xff]  }
  0x47   :  { %1899 = vmatprep.subr.bf16.mxu0 %v2809_v19  ;;  %1939 = vmatpush1.bf16.msra.mxu1 %v2808_v20  ;;  %v2860_v57 = vld [vmem:[#allocation5 + $0x1a4] ss:$8 sps:$4 sm:$0xff]   ;;  %v2859_v58 = vld [vmem:[#allocation5 + $0xa0] ss:$8 sps:$4 sm:$0xff]   ;;  %v2863_v59 = vld [vmem:[#allocation5 + $0x94] ss:$8 sps:$4 sm:$0xff]  }
  0x48   :  { %1940 = vmatprep.subr.bf16.mxu1 %v2812_v21  ;;  %1921 = vmatprep.mubr.bf16.mxu0 %v91_v48  ;;  %v2862_v60 = vld [vmem:[#allocation5 + $0x1a0] ss:$8 sps:$4 sm:$0xff]   ;;  %v2866_v61 = vld [vmem:[#allocation5 + $0x194] ss:$8 sps:$4 sm:$0xff]   ;;  %v2865_v62 = vld [vmem:[#allocation5 + $0x90] ss:$8 sps:$4 sm:$0xff]  }
  0x49   :  { %1962 = vmatprep.mubr.bf16.mxu1 %v93_v52  ;;  %v2869_v63 = vld [vmem:[#allocation5 + $0x84] ss:$8 sps:$4 sm:$0xff]   ;;  %v2868_v0 = vld [vmem:[#allocation5 + $0x190] ss:$8 sps:$4 sm:$0xff]   ;;  %v2871_v1 = vld [vmem:[#allocation5 + $0x80] ss:$8 sps:$4 sm:$0xff]  }
  0x4a   :  { %1900 = vmatpush1.bf16.msra.mxu0 %v2811_v22  ;;  %v2872_v2 = vld [vmem:[#allocation5 + $0x184] ss:$8 sps:$4 sm:$0xff]   ;;  %v2874_v3 = vld [vmem:[#allocation5 + $0x180] ss:$8 sps:$4 sm:$0xff]   ;;  %v2877_v5 = vld [vmem:[#allocation5 + $0x274] ss:$8 sps:$4 sm:$0xff]  }
  0x4b   :  { %1901 = vmatprep.subr.bf16.mxu0 %v2815_v23  ;;  %1941 = vmatpush1.bf16.msra.mxu1 %v2814_v24  ;;  %v73_v6 = vld [vmem:[#allocation2 + $0x10] sm:$0xff]  ;;  %v2883_v11 = vld [vmem:[#allocation5 + $0x264] ss:$8 sps:$4 sm:$0xff]   ;;  %v2881_v14 = vld [vmem:[#allocation5 + $0x260] ss:$8 sps:$4 sm:$0xff]  }
  0x4c   :  { %1942 = vmatprep.subr.bf16.mxu1 %v2818_v25  ;;  %v2880_v8 = vld [vmem:[#allocation5 + $0x374] ss:$8 sps:$4 sm:$0xff]   ;;  %v2875_v9 = vld [vmem:[#allocation5 + $0x270] ss:$8 sps:$4 sm:$0xff]   ;;  %v92_v10 = vpack.c.bf16 %v73_v6, %v73_v6  ;;  %v2886_v13 = vld [vmem:[#allocation5 + $0x364] ss:$8 sps:$4 sm:$0xff]  }
  0x4d   :  { %v2878_v12 = vld [vmem:[#allocation5 + $0x370] ss:$8 sps:$4 sm:$0xff]   ;;  %v2889_v15 = vld [vmem:[#allocation5 + $0x254] ss:$8 sps:$4 sm:$0xff]   ;;  %v2884_v16 = vld [vmem:[#allocation5 + $0x360] ss:$8 sps:$4 sm:$0xff]  }
  0x4e   :  { %1902 = vmatpush1.bf16.msra.mxu0 %v2817_v26  ;;  %v2892_v17 = vld [vmem:[#allocation5 + $0x354] ss:$8 sps:$4 sm:$0xff]   ;;  %v2887_v18 = vld [vmem:[#allocation5 + $0x250] ss:$8 sps:$4 sm:$0xff]   ;;  %v2895_v19 = vld [vmem:[#allocation5 + $0x244] ss:$8 sps:$4 sm:$0xff]  }
  0x4f   :  { %1903 = vmatprep.subr.bf16.mxu0 %v2821_v27  ;;  %1943 = vmatpush1.bf16.msra.mxu1 %v2820_v28  ;;  %v2890_v20 = vld [vmem:[#allocation5 + $0x350] ss:$8 sps:$4 sm:$0xff]   ;;  %v2898_v21 = vld [vmem:[#allocation5 + $0x344] ss:$8 sps:$4 sm:$0xff]   ;;  %v2893_v22 = vld [vmem:[#allocation5 + $0x240] ss:$8 sps:$4 sm:$0xff]  }
  0x50   :  { %1944 = vmatprep.subr.bf16.mxu1 %v2824_v29  ;;  %v2901_v23 = vld [vmem:[#allocation5 + $0x234] ss:$8 sps:$4 sm:$0xff]   ;;  %v2896_v24 = vld [vmem:[#allocation5 + $0x340] ss:$8 sps:$4 sm:$0xff]   ;;  %v2899_v26 = vld [vmem:[#allocation5 + $0x230] ss:$8 sps:$4 sm:$0xff]  }
  0x51   :  { %v2904_v25 = vld [vmem:[#allocation5 + $0x334] ss:$8 sps:$4 sm:$0xff]   ;;  %v2907_v27 = vld [vmem:[#allocation5 + $0x224] ss:$8 sps:$4 sm:$0xff]   ;;  %v2902_v28 = vld [vmem:[#allocation5 + $0x330] ss:$8 sps:$4 sm:$0xff]  }
  0x52   :  { %1904 = vmatpush1.bf16.msra.mxu0 %v2823_v30  ;;  %v2910_v29 = vld [vmem:[#allocation5 + $0x324] ss:$8 sps:$4 sm:$0xff]   ;;  %v2905_v30 = vld [vmem:[#allocation5 + $0x220] ss:$8 sps:$4 sm:$0xff]   ;;  %v2923_v46 = vld [vmem:[#allocation5 + $0x2f0] ss:$8 sps:$4 sm:$0xff]  }
  0x53   :  { %1905 = vmatprep.subr.bf16.mxu0 %v2827_v31  ;;  %1945 = vmatpush1.bf16.msra.mxu1 %v2826_v32  ;;  %v2913_v31 = vld [vmem:[#allocation5 + $0x214] ss:$8 sps:$4 sm:$0xff]   ;;  %v2908_v32 = vld [vmem:[#allocation5 + $0x320] ss:$8 sps:$4 sm:$0xff]   ;;  %v2926_v48 = vld [vmem:[#allocation5 + $0x3f0] ss:$8 sps:$4 sm:$0xff]  }
  0x54   :  { %1946 = vmatprep.subr.bf16.mxu1 %v2830_v33  ;;  %v2916_v33 = vld [vmem:[#allocation5 + $0x314] ss:$8 sps:$4 sm:$0xff]   ;;  %v2929_v50 = vld [vmem:[#allocation5 + $0x2e0] ss:$8 sps:$4 sm:$0xff]   ;;  %v2959_v6 = vld [vmem:[#allocation5 + $0x290] ss:$8 sps:$4 sm:$0xff]  }
  0x55   :  { %v2932_v52 = vld [vmem:[#allocation5 + $0x3e0] ss:$8 sps:$4 sm:$0xff]  }
  0x56   :  { %1906 = vmatpush2.bf16.msra.mxu0 %v2829_v34  ;;  %v76_v34 = vld [vmem:[#allocation2 + $0x28] sm:$0xff]  ;;  %v2956_v4 = vld [vmem:[#allocation5 + $0x3a0] ss:$8 sps:$4 sm:$0xff]  }
  0x57   :  { %1907 = vmatprep.subr.bf16.mxu0 %v2833_v35  ;;  %1947 = vmatpush2.bf16.msra.mxu1 %v2832_v36  ;;  %v2911_v35 = vld [vmem:[#allocation5 + $0x210] ss:$8 sps:$4 sm:$0xff]   ;;  %v95_v36 = vpack.c.bf16 %v76_v34, %v76_v34  ;;  %v2989_v34 = vld [vmem:[#allocation5 + $0x440] ss:$8 sps:$4 sm:$0xff]  }
  0x58   :  { %1948 = vmatprep.subr.bf16.mxu1 %v2836_v37  ;;  %v2919_v37 = vld [vmem:[#allocation5 + $0x204] ss:$8 sps:$4 sm:$0xff]  }
  0x5a   :  { %1908 = vmatpush2.bf16.msra.mxu0 %v2835_v38  ;;  %v78_v38 = vld [vmem:[#allocation2 + $0x38] sm:$0xff] }
  0x5b   :  { %1909 = vmatprep.subr.bf16.mxu0 %v2839_v39  ;;  %1949 = vmatpush2.bf16.msra.mxu1 %v2838_v40  ;;  %v2914_v39 = vld [vmem:[#allocation5 + $0x310] ss:$8 sps:$4 sm:$0xff]   ;;  %v97_v40 = vpack.c.bf16 %v78_v38, %v78_v38 }
  0x5c   :  { %1950 = vmatprep.subr.bf16.mxu1 %v2842_v41  ;;  %v2922_v41 = vld [vmem:[#allocation5 + $0x304] ss:$8 sps:$4 sm:$0xff]   ;;  %v2995_v38 = vld [vmem:[#allocation5 + $0x430] ss:$8 sps:$4 sm:$0xff]  }
  0x5e   :  { %1910 = vmatpush2.bf16.msra.mxu0 %v2841_v42  ;;  %v2917_v42 = vld [vmem:[#allocation5 + $0x200] ss:$8 sps:$4 sm:$0xff]  }
  0x5f   :  { %1911 = vmatprep.subr.bf16.mxu0 %v2845_v43  ;;  %1951 = vmatpush2.bf16.msra.mxu1 %v2844_v44  ;;  %v2925_v43 = vld [vmem:[#allocation5 + $0x2f4] ss:$8 sps:$4 sm:$0xff]   ;;  %v2920_v44 = vld [vmem:[#allocation5 + $0x300] ss:$8 sps:$4 sm:$0xff]  }
  0x60   :  { %1952 = vmatprep.subr.bf16.mxu1 %v2848_v45  ;;  %v2928_v45 = vld [vmem:[#allocation5 + $0x3f4] ss:$8 sps:$4 sm:$0xff]  }
  0x62   :  { %1912 = vmatpush2.bf16.msra.mxu0 %v2847_v47  ;;  %v2931_v47 = vld [vmem:[#allocation5 + $0x2e4] ss:$8 sps:$4 sm:$0xff]  }
  0x63   :  { %1913 = vmatprep.subr.bf16.mxu0 %v2851_v49  ;;  %1953 = vmatpush2.bf16.msra.mxu1 %v2850_v51  ;;  %v2934_v49 = vld [vmem:[#allocation5 + $0x3e4] ss:$8 sps:$4 sm:$0xff]   ;;  %v2937_v51 = vld [vmem:[#allocation5 + $0x2d4] ss:$8 sps:$4 sm:$0xff]  }
  0x64   :  { %1954 = vmatprep.subr.bf16.mxu1 %v2854_v53  ;;  %v2940_v53 = vld [vmem:[#allocation5 + $0x3d4] ss:$8 sps:$4 sm:$0xff]  }
  0x66   :  { %1914 = vmatpush2.bf16.msra.mxu0 %v2853_v54  ;;  %v2935_v54 = vld [vmem:[#allocation5 + $0x2d0] ss:$8 sps:$4 sm:$0xff]  }
  0x67   :  { %1915 = vmatprep.subr.bf16.mxu0 %v2857_v55  ;;  %1955 = vmatpush2.bf16.msra.mxu1 %v2856_v56  ;;  %v2943_v55 = vld [vmem:[#allocation5 + $0x2c4] ss:$8 sps:$4 sm:$0xff]   ;;  %v2938_v56 = vld [vmem:[#allocation5 + $0x3d0] ss:$8 sps:$4 sm:$0xff]  }
  0x68   :  { %1956 = vmatprep.subr.bf16.mxu1 %v2860_v57  ;;  %v2946_v57 = vld [vmem:[#allocation5 + $0x3c4] ss:$8 sps:$4 sm:$0xff]  }
  0x6a   :  { %1916 = vmatpush2.bf16.msra.mxu0 %v2859_v58  ;;  %v2941_v58 = vld [vmem:[#allocation5 + $0x2c0] ss:$8 sps:$4 sm:$0xff]  }
  0x6b   :  { %1917 = vmatprep.subr.bf16.mxu0 %v2863_v59  ;;  %1957 = vmatpush2.bf16.msra.mxu1 %v2862_v60  ;;  %v2949_v59 = vld [vmem:[#allocation5 + $0x2b4] ss:$8 sps:$4 sm:$0xff]   ;;  %v2944_v60 = vld [vmem:[#allocation5 + $0x3c0] ss:$8 sps:$4 sm:$0xff]  }
  0x6c   :  { %1958 = vmatprep.subr.bf16.mxu1 %v2866_v61  ;;  %v2952_v61 = vld [vmem:[#allocation5 + $0x3b4] ss:$8 sps:$4 sm:$0xff]  }
  0x6e   :  { %1918 = vmatpush2.bf16.msra.mxu0 %v2865_v62  ;;  %v2947_v62 = vld [vmem:[#allocation5 + $0x2b0] ss:$8 sps:$4 sm:$0xff]  }
  0x6f   :  { %1919 = vmatprep.subr.bf16.mxu0 %v2869_v63  ;;  %1959 = vmatpush2.bf16.msra.mxu1 %v2868_v0  ;;  %v2955_v63 = vld [vmem:[#allocation5 + $0x2a4] ss:$8 sps:$4 sm:$0xff]   ;;  %v2950_v0 = vld [vmem:[#allocation5 + $0x3b0] ss:$8 sps:$4 sm:$0xff]  }
  0x70   :  { %1960 = vmatprep.subr.bf16.mxu1 %v2872_v2  ;;  %v2953_v2 = vld [vmem:[#allocation5 + $0x2a0] ss:$8 sps:$4 sm:$0xff]  }
  0x72   :  { %1920 = vmatpush2.bf16.msra.mxu0 %v2871_v1  ;;  %v2958_v1 = vld [vmem:[#allocation5 + $0x3a4] ss:$8 sps:$4 sm:$0xff]  }
  0x73   :  { %1971 = vmatprep.subr.bf16.mxu0 %v2877_v5  ;;  %1961 = vmatpush2.bf16.msra.mxu1 %v2874_v3  ;;  %v2961_v3 = vld [vmem:[#allocation5 + $0x294] ss:$8 sps:$4 sm:$0xff]  }
  0x74   :  { %2012 = vmatprep.subr.bf16.mxu1 %v2880_v8  ;;  %v2964_v5 = vld [vmem:[#allocation5 + $0x394] ss:$8 sps:$4 sm:$0xff]   ;;  %v2962_v8 = vld [vmem:[#allocation5 + $0x390] ss:$8 sps:$4 sm:$0xff]  }
  0x75   :  { %1922 = vmatmul.mubr.bf16.vlgmr.msra.gmra.mxu0 %v90_v7  ;;  %v2967_v7 = vld [vmem:[#allocation5 + $0x284] ss:$8 sps:$4 sm:$0xff]  }
  0x76   :  { %1972 = vmatpush1.bf16.msra.mxu0 %v2875_v9  ;;  %1963 = vmatmul.mubr.bf16.vlgmr.msra.gmra.mxu1 %v92_v10  ;;  %v2965_v9 = vld [vmem:[#allocation5 + $0x280] ss:$8 sps:$4 sm:$0xff]   ;;  %v2970_v10 = vld [vmem:[#allocation5 + $0x384] ss:$8 sps:$4 sm:$0xff]  }
  0x77   :  { %1973 = vmatprep.subr.bf16.mxu0 %v2883_v11  ;;  %2013 = vmatpush1.bf16.msra.mxu1 %v2878_v12  ;;  %v2968_v11 = vld [vmem:[#allocation5 + $0x380] ss:$8 sps:$4 sm:$0xff]  }
  0x78   :  { %2014 = vmatprep.subr.bf16.mxu1 %v2886_v13  ;;  %2003 = vmatprep.mubr.bf16.mxu0 %v95_v36  ;;  %v75_v12 = vld [vmem:[#allocation2 + $0x20] sm:$0xff]  ;;  %v2973_v13 = vld [vmem:[#allocation5 + $0x474] ss:$8 sps:$4 sm:$0xff]  }
  0x79   :  { %2044 = vmatprep.mubr.bf16.mxu1 %v97_v40  ;;  %v2992_v36 = vld [vmem:[#allocation5 + $0x540] ss:$8 sps:$4 sm:$0xff]   ;;  %v2998_v40 = vld [vmem:[#allocation5 + $0x530] ss:$8 sps:$4 sm:$0xff]  }
  0x7a   :  { %1974 = vmatpush1.bf16.msra.mxu0 %v2881_v14  ;;  %v77_v14 = vld [vmem:[#allocation2 + $0x30] sm:$0xff] }
  0x7b   :  { %1975 = vmatprep.subr.bf16.mxu0 %v2889_v15  ;;  %2015 = vmatpush1.bf16.msra.mxu1 %v2884_v16  ;;  %v94_v15 = vpack.c.bf16 %v75_v12, %v75_v12  ;;  %v2976_v16 = vld [vmem:[#allocation5 + $0x574] ss:$8 sps:$4 sm:$0xff]   ;;  %v3052_v12 = vld [vmem:[#allocation5 + $0x5a0] ss:$8 sps:$4 sm:$0xff]  }
  0x7c   :  { %2016 = vmatprep.subr.bf16.mxu1 %v2892_v17  ;;  %v2971_v17 = vld [vmem:[#allocation5 + $0x470] ss:$8 sps:$4 sm:$0xff]  }
  0x7e   :  { %1976 = vmatpush1.bf16.msra.mxu0 %v2887_v18  ;;  %v96_v18 = vpack.c.bf16 %v77_v14, %v77_v14  ;;  %v3055_v14 = vld [vmem:[#allocation5 + $0x490] ss:$8 sps:$4 sm:$0xff]  }
  0x7f   :  { %1977 = vmatprep.subr.bf16.mxu0 %v2895_v19  ;;  %2017 = vmatpush1.bf16.msra.mxu1 %v2890_v20  ;;  %v2979_v19 = vld [vmem:[#allocation5 + $0x464] ss:$8 sps:$4 sm:$0xff]   ;;  %v2974_v20 = vld [vmem:[#allocation5 + $0x570] ss:$8 sps:$4 sm:$0xff]  }
  0x80   :  { %2018 = vmatprep.subr.bf16.mxu1 %v2898_v21  ;;  %v2982_v21 = vld [vmem:[#allocation5 + $0x564] ss:$8 sps:$4 sm:$0xff]  }
  0x82   :  { %1978 = vmatpush1.bf16.msra.mxu0 %v2893_v22  ;;  %v80_v22 = vld [vmem:[#allocation2 + $0x48] sm:$0xff] }
  0x83   :  { %1979 = vmatprep.subr.bf16.mxu0 %v2901_v23  ;;  %2019 = vmatpush1.bf16.msra.mxu1 %v2896_v24  ;;  %v2977_v23 = vld [vmem:[#allocation5 + $0x460] ss:$8 sps:$4 sm:$0xff]   ;;  %v99_v24 = vpack.c.bf16 %v80_v22, %v80_v22 }
  0x84   :  { %2020 = vmatprep.subr.bf16.mxu1 %v2904_v25  ;;  %v2985_v25 = vld [vmem:[#allocation5 + $0x454] ss:$8 sps:$4 sm:$0xff]   ;;  %v3064_v22 = vld [vmem:[#allocation5 + $0x580] ss:$8 sps:$4 sm:$0xff]  }
  0x86   :  { %1980 = vmatpush1.bf16.msra.mxu0 %v2899_v26  ;;  %v82_v26 = vld [vmem:[#allocation2 + $0x58] sm:$0xff] }
  0x87   :  { %1981 = vmatprep.subr.bf16.mxu0 %v2907_v27  ;;  %2021 = vmatpush1.bf16.msra.mxu1 %v2902_v28  ;;  %v2980_v27 = vld [vmem:[#allocation5 + $0x560] ss:$8 sps:$4 sm:$0xff]   ;;  %v101_v28 = vpack.c.bf16 %v82_v26, %v82_v26 }
  0x88   :  { %2022 = vmatprep.subr.bf16.mxu1 %v2910_v29  ;;  %v2988_v29 = vld [vmem:[#allocation5 + $0x554] ss:$8 sps:$4 sm:$0xff]   ;;  %v86_v26 = vld [vmem:[#allocation2 + $0x78] sm:$0xff] }
  0x8a   :  { %1982 = vmatpush1.bf16.msra.mxu0 %v2905_v30  ;;  %v2983_v30 = vld [vmem:[#allocation5 + $0x450] ss:$8 sps:$4 sm:$0xff]  }
  0x8b   :  { %1983 = vmatprep.subr.bf16.mxu0 %v2913_v31  ;;  %2023 = vmatpush1.bf16.msra.mxu1 %v2908_v32  ;;  %v2991_v31 = vld [vmem:[#allocation5 + $0x444] ss:$8 sps:$4 sm:$0xff]   ;;  %v2986_v32 = vld [vmem:[#allocation5 + $0x550] ss:$8 sps:$4 sm:$0xff]  }
  0x8c   :  { %2024 = vmatprep.subr.bf16.mxu1 %v2916_v33  ;;  %v2994_v33 = vld [vmem:[#allocation5 + $0x544] ss:$8 sps:$4 sm:$0xff]  }
  0x8e   :  { %1984 = vmatpush1.bf16.msra.mxu0 %v2911_v35  ;;  %v2997_v35 = vld [vmem:[#allocation5 + $0x434] ss:$8 sps:$4 sm:$0xff]  }
  0x8f   :  { %1985 = vmatprep.subr.bf16.mxu0 %v2919_v37  ;;  %2025 = vmatpush1.bf16.msra.mxu1 %v2914_v39  ;;  %v3000_v37 = vld [vmem:[#allocation5 + $0x534] ss:$8 sps:$4 sm:$0xff]   ;;  %v3003_v39 = vld [vmem:[#allocation5 + $0x424] ss:$8 sps:$4 sm:$0xff]  }
  0x90   :  { %2026 = vmatprep.subr.bf16.mxu1 %v2922_v41  ;;  %v3006_v41 = vld [vmem:[#allocation5 + $0x524] ss:$8 sps:$4 sm:$0xff]  }
  0x92   :  { %1986 = vmatpush1.bf16.msra.mxu0 %v2917_v42  ;;  %v3001_v42 = vld [vmem:[#allocation5 + $0x420] ss:$8 sps:$4 sm:$0xff]  }
  0x93   :  { %1987 = vmatprep.subr.bf16.mxu0 %v2925_v43  ;;  %2027 = vmatpush1.bf16.msra.mxu1 %v2920_v44  ;;  %v3009_v43 = vld [vmem:[#allocation5 + $0x414] ss:$8 sps:$4 sm:$0xff]   ;;  %v3004_v44 = vld [vmem:[#allocation5 + $0x520] ss:$8 sps:$4 sm:$0xff]  }
  0x94   :  { %2028 = vmatprep.subr.bf16.mxu1 %v2928_v45  ;;  %v3012_v45 = vld [vmem:[#allocation5 + $0x514] ss:$8 sps:$4 sm:$0xff]  }
  0x96   :  { %1988 = vmatpush2.bf16.msra.mxu0 %v2923_v46  ;;  %v3007_v46 = vld [vmem:[#allocation5 + $0x410] ss:$8 sps:$4 sm:$0xff]  }
  0x97   :  { %1989 = vmatprep.subr.bf16.mxu0 %v2931_v47  ;;  %2029 = vmatpush2.bf16.msra.mxu1 %v2926_v48  ;;  %v3015_v47 = vld [vmem:[#allocation5 + $0x404] ss:$8 sps:$4 sm:$0xff]   ;;  %v3010_v48 = vld [vmem:[#allocation5 + $0x510] ss:$8 sps:$4 sm:$0xff]  }
  0x98   :  { %2030 = vmatprep.subr.bf16.mxu1 %v2934_v49  ;;  %v3018_v49 = vld [vmem:[#allocation5 + $0x504] ss:$8 sps:$4 sm:$0xff]  }
  0x9a   :  { %1990 = vmatpush2.bf16.msra.mxu0 %v2929_v50  ;;  %v3013_v50 = vld [vmem:[#allocation5 + $0x400] ss:$8 sps:$4 sm:$0xff]  }
  0x9b   :  { %1991 = vmatprep.subr.bf16.mxu0 %v2937_v51  ;;  %2031 = vmatpush2.bf16.msra.mxu1 %v2932_v52  ;;  %v3021_v51 = vld [vmem:[#allocation5 + $0x4f4] ss:$8 sps:$4 sm:$0xff]   ;;  %v3016_v52 = vld [vmem:[#allocation5 + $0x500] ss:$8 sps:$4 sm:$0xff]  }
  0x9c   :  { %2032 = vmatprep.subr.bf16.mxu1 %v2940_v53  ;;  %v3024_v53 = vld [vmem:[#allocation5 + $0x5f4] ss:$8 sps:$4 sm:$0xff]  }
  0x9e   :  { %1992 = vmatpush2.bf16.msra.mxu0 %v2935_v54  ;;  %v3019_v54 = vld [vmem:[#allocation5 + $0x4f0] ss:$8 sps:$4 sm:$0xff]  }
  0x9f   :  { %1993 = vmatprep.subr.bf16.mxu0 %v2943_v55  ;;  %2033 = vmatpush2.bf16.msra.mxu1 %v2938_v56  ;;  %v3027_v55 = vld [vmem:[#allocation5 + $0x4e4] ss:$8 sps:$4 sm:$0xff]   ;;  %v3022_v56 = vld [vmem:[#allocation5 + $0x5f0] ss:$8 sps:$4 sm:$0xff]  }
  0xa0   :  { %2034 = vmatprep.subr.bf16.mxu1 %v2946_v57  ;;  %v3030_v57 = vld [vmem:[#allocation5 + $0x5e4] ss:$8 sps:$4 sm:$0xff]  }
  0xa2   :  { %1994 = vmatpush2.bf16.msra.mxu0 %v2941_v58  ;;  %v3025_v58 = vld [vmem:[#allocation5 + $0x4e0] ss:$8 sps:$4 sm:$0xff]  }
  0xa3   :  { %1995 = vmatprep.subr.bf16.mxu0 %v2949_v59  ;;  %2035 = vmatpush2.bf16.msra.mxu1 %v2944_v60  ;;  %v3033_v59 = vld [vmem:[#allocation5 + $0x4d4] ss:$8 sps:$4 sm:$0xff]   ;;  %v3028_v60 = vld [vmem:[#allocation5 + $0x5e0] ss:$8 sps:$4 sm:$0xff]  }
  0xa4   :  { %2036 = vmatprep.subr.bf16.mxu1 %v2952_v61  ;;  %v3036_v61 = vld [vmem:[#allocation5 + $0x5d4] ss:$8 sps:$4 sm:$0xff]  }
  0xa6   :  { %1996 = vmatpush2.bf16.msra.mxu0 %v2947_v62  ;;  %v3031_v62 = vld [vmem:[#allocation5 + $0x4d0] ss:$8 sps:$4 sm:$0xff]  }
  0xa7   :  { %1997 = vmatprep.subr.bf16.mxu0 %v2955_v63  ;;  %2037 = vmatpush2.bf16.msra.mxu1 %v2950_v0  ;;  %v3039_v63 = vld [vmem:[#allocation5 + $0x4c4] ss:$8 sps:$4 sm:$0xff]   ;;  %v3034_v0 = vld [vmem:[#allocation5 + $0x5d0] ss:$8 sps:$4 sm:$0xff]  }
  0xa8   :  { %2038 = vmatprep.subr.bf16.mxu1 %v2958_v1  ;;  %v3042_v1 = vld [vmem:[#allocation5 + $0x5c4] ss:$8 sps:$4 sm:$0xff]  }
  0xaa   :  { %1998 = vmatpush2.bf16.msra.mxu0 %v2953_v2  ;;  %v3037_v2 = vld [vmem:[#allocation5 + $0x4c0] ss:$8 sps:$4 sm:$0xff]  }
  0xab   :  { %1999 = vmatprep.subr.bf16.mxu0 %v2961_v3  ;;  %2039 = vmatpush2.bf16.msra.mxu1 %v2956_v4  ;;  %v3045_v3 = vld [vmem:[#allocation5 + $0x4b4] ss:$8 sps:$4 sm:$0xff]   ;;  %v3040_v4 = vld [vmem:[#allocation5 + $0x5c0] ss:$8 sps:$4 sm:$0xff]  }
  0xac   :  { %2040 = vmatprep.subr.bf16.mxu1 %v2964_v5  ;;  %v3048_v5 = vld [vmem:[#allocation5 + $0x5b4] ss:$8 sps:$4 sm:$0xff]  }
  0xae   :  { %2000 = vmatpush2.bf16.msra.mxu0 %v2959_v6  ;;  %v3043_v6 = vld [vmem:[#allocation5 + $0x4b0] ss:$8 sps:$4 sm:$0xff]  }
  0xaf   :  { %2001 = vmatprep.subr.bf16.mxu0 %v2967_v7  ;;  %2041 = vmatpush2.bf16.msra.mxu1 %v2962_v8  ;;  %v3051_v7 = vld [vmem:[#allocation5 + $0x4a4] ss:$8 sps:$4 sm:$0xff]   ;;  %v3046_v8 = vld [vmem:[#allocation5 + $0x5b0] ss:$8 sps:$4 sm:$0xff]  }
  0xb0   :  { %2042 = vmatprep.subr.bf16.mxu1 %v2970_v10  ;;  %v3049_v10 = vld [vmem:[#allocation5 + $0x4a0] ss:$8 sps:$4 sm:$0xff]  }
  0xb2   :  { %2002 = vmatpush2.bf16.msra.mxu0 %v2965_v9  ;;  %v3054_v9 = vld [vmem:[#allocation5 + $0x5a4] ss:$8 sps:$4 sm:$0xff]  }
  0xb3   :  { %2053 = vmatprep.subr.bf16.mxu0 %v2973_v13  ;;  %2043 = vmatpush2.bf16.msra.mxu1 %v2968_v11  ;;  %v3057_v11 = vld [vmem:[#allocation5 + $0x494] ss:$8 sps:$4 sm:$0xff]  }
  0xb4   :  { %2094 = vmatprep.subr.bf16.mxu1 %v2976_v16  ;;  %v3060_v13 = vld [vmem:[#allocation5 + $0x594] ss:$8 sps:$4 sm:$0xff]   ;;  %v3058_v16 = vld [vmem:[#allocation5 + $0x590] ss:$8 sps:$4 sm:$0xff]  }
  0xb5   :  { %2004 = vmatmul.mubr.bf16.vlgmr.msra.gmra.mxu0 %v94_v15  ;;  %v3063_v15 = vld [vmem:[#allocation5 + $0x484] ss:$8 sps:$4 sm:$0xff]  }
  0xb6   :  { %2054 = vmatpush1.bf16.msra.mxu0 %v2971_v17  ;;  %2045 = vmatmul.mubr.bf16.vlgmr.msra.gmra.mxu1 %v96_v18  ;;  %v3061_v17 = vld [vmem:[#allocation5 + $0x480] ss:$8 sps:$4 sm:$0xff]   ;;  %v3066_v18 = vld [vmem:[#allocation5 + $0x584] ss:$8 sps:$4 sm:$0xff]  }
  0xb7   :  { %2055 = vmatprep.subr.bf16.mxu0 %v2979_v19  ;;  %2095 = vmatpush1.bf16.msra.mxu1 %v2974_v20  ;;  %v79_v19 = vld [vmem:[#allocation2 + $0x40] sm:$0xff]  ;;  %v3069_v20 = vld [vmem:[#allocation5 + $0x674] ss:$8 sps:$4 sm:$0xff]  }
  0xb8   :  { %2085 = vmatprep.mubr.bf16.mxu0 %v99_v24  ;;  %2096 = vmatprep.subr.bf16.mxu1 %v2982_v21  ;;  %v84_v21 = vld [vmem:[#allocation2 + $0x68] sm:$0xff]  ;;  %v98_v24 = vpack.c.bf16 %v79_v19, %v79_v19  ;;  %v405_v19 = vlaneseq }
  0xb9   :  { %2126 = vmatprep.mubr.bf16.mxu1 %v101_v28  ;;  %v103_v28 = vpack.c.bf16 %v84_v21, %v84_v21  ;;  %v3148_v21 = vld [vmem:[#allocation5 + $0x7a0] ss:$8 sps:$4 sm:$0xff]  }
  0xba   :  { %2056 = vmatpush1.bf16.msra.mxu0 %v2977_v23  ;;  %v81_v23 = vld [vmem:[#allocation2 + $0x50] sm:$0xff] }
  0xbb   :  { %2057 = vmatprep.subr.bf16.mxu0 %v2985_v25  ;;  %2097 = vmatpush1.bf16.msra.mxu1 %v2980_v27  ;;  %v3072_v25 = vld [vmem:[#allocation5 + $0x774] ss:$8 sps:$4 sm:$0xff]   ;;  %v3067_v27 = vld [vmem:[#allocation5 + $0x670] ss:$8 sps:$4 sm:$0xff]  }
  0xbc   :  { %2098 = vmatprep.subr.bf16.mxu1 %v2988_v29  ;;  %v100_v29 = vpack.c.bf16 %v81_v23, %v81_v23  ;;  %v3151_v23 = vld [vmem:[#allocation5 + $0x690] ss:$8 sps:$4 sm:$0xff]  }
  0xbe   :  { %2058 = vmatpush1.bf16.msra.mxu0 %v2983_v30  ;;  %v3075_v30 = vld [vmem:[#allocation5 + $0x664] ss:$8 sps:$4 sm:$0xff]  }
  0xbf   :  { %2059 = vmatprep.subr.bf16.mxu0 %v2991_v31  ;;  %2099 = vmatpush1.bf16.msra.mxu1 %v2986_v32  ;;  %v3070_v31 = vld [vmem:[#allocation5 + $0x770] ss:$8 sps:$4 sm:$0xff]   ;;  %v105_v32 = vpack.c.bf16 %v86_v26, %v86_v26 }
  0xc0   :  { %2100 = vmatprep.subr.bf16.mxu1 %v2994_v33  ;;  %v3078_v33 = vld [vmem:[#allocation5 + $0x764] ss:$8 sps:$4 sm:$0xff]   ;;  %v3154_v26 = vld [vmem:[#allocation5 + $0x790] ss:$8 sps:$4 sm:$0xff]  }
  0xc2   :  { %2060 = vmatpush1.bf16.msra.mxu0 %v2989_v34  ;;  %v3073_v34 = vld [vmem:[#allocation5 + $0x660] ss:$8 sps:$4 sm:$0xff]  }
  0xc3   :  { %2061 = vmatprep.subr.bf16.mxu0 %v2997_v35  ;;  %2101 = vmatpush1.bf16.msra.mxu1 %v2992_v36  ;;  %v3081_v35 = vld [vmem:[#allocation5 + $0x654] ss:$8 sps:$4 sm:$0xff]   ;;  %v3076_v36 = vld [vmem:[#allocation5 + $0x760] ss:$8 sps:$4 sm:$0xff]  }
  0xc4   :  { %2102 = vmatprep.subr.bf16.mxu1 %v3000_v37  ;;  %v3084_v37 = vld [vmem:[#allocation5 + $0x754] ss:$8 sps:$4 sm:$0xff]  }
  0xc6   :  { %2062 = vmatpush1.bf16.msra.mxu0 %v2995_v38  ;;  %v3079_v38 = vld [vmem:[#allocation5 + $0x650] ss:$8 sps:$4 sm:$0xff]  }
  0xc7   :  { %2063 = vmatprep.subr.bf16.mxu0 %v3003_v39  ;;  %2103 = vmatpush1.bf16.msra.mxu1 %v2998_v40  ;;  %v3087_v39 = vld [vmem:[#allocation5 + $0x644] ss:$8 sps:$4 sm:$0xff]   ;;  %v3082_v40 = vld [vmem:[#allocation5 + $0x750] ss:$8 sps:$4 sm:$0xff]  }
  0xc8   :  { %2104 = vmatprep.subr.bf16.mxu1 %v3006_v41  ;;  %v3090_v41 = vld [vmem:[#allocation5 + $0x744] ss:$8 sps:$4 sm:$0xff]  }
  0xca   :  { %2064 = vmatpush1.bf16.msra.mxu0 %v3001_v42  ;;  %v3085_v42 = vld [vmem:[#allocation5 + $0x640] ss:$8 sps:$4 sm:$0xff]  }
  0xcb   :  { %2065 = vmatprep.subr.bf16.mxu0 %v3009_v43  ;;  %2105 = vmatpush1.bf16.msra.mxu1 %v3004_v44  ;;  %v3093_v43 = vld [vmem:[#allocation5 + $0x634] ss:$8 sps:$4 sm:$0xff]   ;;  %v3088_v44 = vld [vmem:[#allocation5 + $0x740] ss:$8 sps:$4 sm:$0xff]  }
  0xcc   :  { %2106 = vmatprep.subr.bf16.mxu1 %v3012_v45  ;;  %v3096_v45 = vld [vmem:[#allocation5 + $0x734] ss:$8 sps:$4 sm:$0xff]  }
  0xce   :  { %2066 = vmatpush1.bf16.msra.mxu0 %v3007_v46  ;;  %v3091_v46 = vld [vmem:[#allocation5 + $0x630] ss:$8 sps:$4 sm:$0xff]  }
  0xcf   :  { %2067 = vmatprep.subr.bf16.mxu0 %v3015_v47  ;;  %2107 = vmatpush1.bf16.msra.mxu1 %v3010_v48  ;;  %v3099_v47 = vld [vmem:[#allocation5 + $0x624] ss:$8 sps:$4 sm:$0xff]   ;;  %v3094_v48 = vld [vmem:[#allocation5 + $0x730] ss:$8 sps:$4 sm:$0xff]  }
  0xd0   :  { %2108 = vmatprep.subr.bf16.mxu1 %v3018_v49  ;;  %v3102_v49 = vld [vmem:[#allocation5 + $0x724] ss:$8 sps:$4 sm:$0xff]  }
  0xd2   :  { %2068 = vmatpush1.bf16.msra.mxu0 %v3013_v50  ;;  %v3097_v50 = vld [vmem:[#allocation5 + $0x620] ss:$8 sps:$4 sm:$0xff]  }
  0xd3   :  { %2069 = vmatprep.subr.bf16.mxu0 %v3021_v51  ;;  %2109 = vmatpush1.bf16.msra.mxu1 %v3016_v52  ;;  %v3105_v51 = vld [vmem:[#allocation5 + $0x614] ss:$8 sps:$4 sm:$0xff]   ;;  %v3100_v52 = vld [vmem:[#allocation5 + $0x720] ss:$8 sps:$4 sm:$0xff]  }
  0xd4   :  { %2110 = vmatprep.subr.bf16.mxu1 %v3024_v53  ;;  %v3108_v53 = vld [vmem:[#allocation5 + $0x714] ss:$8 sps:$4 sm:$0xff]  }
  0xd6   :  { %2070 = vmatpush2.bf16.msra.mxu0 %v3019_v54  ;;  %v3103_v54 = vld [vmem:[#allocation5 + $0x610] ss:$8 sps:$4 sm:$0xff]  }
  0xd7   :  { %2071 = vmatprep.subr.bf16.mxu0 %v3027_v55  ;;  %2111 = vmatpush2.bf16.msra.mxu1 %v3022_v56  ;;  %v3111_v55 = vld [vmem:[#allocation5 + $0x604] ss:$8 sps:$4 sm:$0xff]   ;;  %v3106_v56 = vld [vmem:[#allocation5 + $0x710] ss:$8 sps:$4 sm:$0xff]  }
  0xd8   :  { %2112 = vmatprep.subr.bf16.mxu1 %v3030_v57  ;;  %v3114_v57 = vld [vmem:[#allocation5 + $0x704] ss:$8 sps:$4 sm:$0xff]  }
  0xda   :  { %2072 = vmatpush2.bf16.msra.mxu0 %v3025_v58  ;;  %v3109_v58 = vld [vmem:[#allocation5 + $0x600] ss:$8 sps:$4 sm:$0xff]  }
  0xdb   :  { %2073 = vmatprep.subr.bf16.mxu0 %v3033_v59  ;;  %2113 = vmatpush2.bf16.msra.mxu1 %v3028_v60  ;;  %v3117_v59 = vld [vmem:[#allocation5 + $0x6f4] ss:$8 sps:$4 sm:$0xff]   ;;  %v3112_v60 = vld [vmem:[#allocation5 + $0x700] ss:$8 sps:$4 sm:$0xff]  }
  0xdc   :  { %2114 = vmatprep.subr.bf16.mxu1 %v3036_v61  ;;  %v3120_v61 = vld [vmem:[#allocation5 + $0x7f4] ss:$8 sps:$4 sm:$0xff]  }
  0xde   :  { %2074 = vmatpush2.bf16.msra.mxu0 %v3031_v62  ;;  %v3115_v62 = vld [vmem:[#allocation5 + $0x6f0] ss:$8 sps:$4 sm:$0xff]  }
  0xdf   :  { %2075 = vmatprep.subr.bf16.mxu0 %v3039_v63  ;;  %2115 = vmatpush2.bf16.msra.mxu1 %v3034_v0  ;;  %v3123_v63 = vld [vmem:[#allocation5 + $0x6e4] ss:$8 sps:$4 sm:$0xff]   ;;  %v3118_v0 = vld [vmem:[#allocation5 + $0x7f0] ss:$8 sps:$4 sm:$0xff]  }
  0xe0   :  { %2116 = vmatprep.subr.bf16.mxu1 %v3042_v1  ;;  %v3126_v1 = vld [vmem:[#allocation5 + $0x7e4] ss:$8 sps:$4 sm:$0xff]  }
  0xe2   :  { %2076 = vmatpush2.bf16.msra.mxu0 %v3037_v2  ;;  %v3121_v2 = vld [vmem:[#allocation5 + $0x6e0] ss:$8 sps:$4 sm:$0xff]  }
  0xe3   :  { %2077 = vmatprep.subr.bf16.mxu0 %v3045_v3  ;;  %2117 = vmatpush2.bf16.msra.mxu1 %v3040_v4  ;;  %v3129_v3 = vld [vmem:[#allocation5 + $0x6d4] ss:$8 sps:$4 sm:$0xff]   ;;  %v3124_v4 = vld [vmem:[#allocation5 + $0x7e0] ss:$8 sps:$4 sm:$0xff]  }
  0xe4   :  { %2118 = vmatprep.subr.bf16.mxu1 %v3048_v5  ;;  %v3132_v5 = vld [vmem:[#allocation5 + $0x7d4] ss:$8 sps:$4 sm:$0xff]  }
  0xe6   :  { %2078 = vmatpush2.bf16.msra.mxu0 %v3043_v6  ;;  %v3127_v6 = vld [vmem:[#allocation5 + $0x6d0] ss:$8 sps:$4 sm:$0xff]  }
  0xe7   :  { %2079 = vmatprep.subr.bf16.mxu0 %v3051_v7  ;;  %2119 = vmatpush2.bf16.msra.mxu1 %v3046_v8  ;;  %v3135_v7 = vld [vmem:[#allocation5 + $0x6c4] ss:$8 sps:$4 sm:$0xff]   ;;  %v3130_v8 = vld [vmem:[#allocation5 + $0x7d0] ss:$8 sps:$4 sm:$0xff]  }
  0xe8   :  { %2120 = vmatprep.subr.bf16.mxu1 %v3054_v9  ;;  %v3138_v9 = vld [vmem:[#allocation5 + $0x7c4] ss:$8 sps:$4 sm:$0xff]  }
  0xea   :  { %2080 = vmatpush2.bf16.msra.mxu0 %v3049_v10  ;;  %v3133_v10 = vld [vmem:[#allocation5 + $0x6c0] ss:$8 sps:$4 sm:$0xff]  }
  0xeb   :  { %2081 = vmatprep.subr.bf16.mxu0 %v3057_v11  ;;  %2121 = vmatpush2.bf16.msra.mxu1 %v3052_v12  ;;  %v3141_v11 = vld [vmem:[#allocation5 + $0x6b4] ss:$8 sps:$4 sm:$0xff]   ;;  %v3136_v12 = vld [vmem:[#allocation5 + $0x7c0] ss:$8 sps:$4 sm:$0xff]  }
  0xec   :  { %2122 = vmatprep.subr.bf16.mxu1 %v3060_v13  ;;  %v3144_v13 = vld [vmem:[#allocation5 + $0x7b4] ss:$8 sps:$4 sm:$0xff]  }
  0xee   :  { %2082 = vmatpush2.bf16.msra.mxu0 %v3055_v14  ;;  %v3139_v14 = vld [vmem:[#allocation5 + $0x6b0] ss:$8 sps:$4 sm:$0xff]  }
  0xef   :  { %2083 = vmatprep.subr.bf16.mxu0 %v3063_v15  ;;  %2123 = vmatpush2.bf16.msra.mxu1 %v3058_v16  ;;  %v3147_v15 = vld [vmem:[#allocation5 + $0x6a4] ss:$8 sps:$4 sm:$0xff]   ;;  %v3142_v16 = vld [vmem:[#allocation5 + $0x7b0] ss:$8 sps:$4 sm:$0xff]  }
  0xf0   :  { %2124 = vmatprep.subr.bf16.mxu1 %v3066_v18  ;;  %v3145_v18 = vld [vmem:[#allocation5 + $0x6a0] ss:$8 sps:$4 sm:$0xff]  }
  0xf2   :  { %2084 = vmatpush2.bf16.msra.mxu0 %v3061_v17  ;;  %v3150_v17 = vld [vmem:[#allocation5 + $0x7a4] ss:$8 sps:$4 sm:$0xff]  }
  0xf3   :  { %2135 = vmatprep.subr.bf16.mxu0 %v3069_v20  ;;  %2125 = vmatpush2.bf16.msra.mxu1 %v3064_v22  ;;  %v3153_v20 = vld [vmem:[#allocation5 + $0x694] ss:$8 sps:$4 sm:$0xff]  }
  0xf4   :  { %2176 = vmatprep.subr.bf16.mxu1 %v3072_v25  ;;  %v3156_v22 = vld [vmem:[#allocation5 + $0x794] ss:$8 sps:$4 sm:$0xff]   ;;  %v3159_v25 = vld [vmem:[#allocation5 + $0x684] ss:$8 sps:$4 sm:$0xff]  }
  0xf5   :  { %2086 = vmatmul.mubr.bf16.vlgmr.msra.gmra.mxu0 %v98_v24  ;;  %v406_v24 = vshrl.u32 %v405_v19, 7  ;;  %v3193_v19 = vld [vmem:[#allocation5 + $0x8d0] ss:$8 sps:$4 sm:$0xff]  }
  0xf6   :  { %2136 = vmatpush1.bf16.msra.mxu0 %v3067_v27  ;;  %2167 = vmatprep.mubr.bf16.mxu0 %v103_v28  ;;  %v3162_v27 = vld [vmem:[#allocation5 + $0x784] ss:$8 sps:$4 sm:$0xff]   ;;  %v3157_v28 = vld [vmem:[#allocation5 + $0x680] ss:$8 sps:$4 sm:$0xff]  }
  0xf7   :  { %2127 = vmatmul.mubr.bf16.vlgmr.msra.gmra.mxu1 %v100_v29  ;;  %2137 = vmatprep.subr.bf16.mxu0 %v3075_v30  ;;  %v407_v29 = vsub.s32 0, %v406_v24  ;;  %v83_v30 = vld [vmem:[#allocation2 + $0x60] sm:$0xff] }
  0xf8   :  { %2177 = vmatpush1.bf16.msra.mxu1 %v3070_v31  ;;  %2208 = vmatprep.mubr.bf16.mxu1 %v105_v32  ;;  %v403_v31 = vld [vmem:[#allocation7] sm:$0x3]  ;;  %v3165_v32 = vld [vmem:[#allocation5 + $0x874] ss:$8 sps:$4 sm:$0xff]  }
  0xf9   :  { %2178 = vmatprep.subr.bf16.mxu1 %v3078_v33  ;;  %v88_v33 = vld [vmem:[#allocation2 + $0x88] sm:$0xff] }
  0xfa   :  { %2138 = vmatpush1.bf16.msra.mxu0 %v3073_v34  ;;  %v3160_v34 = vld [vmem:[#allocation5 + $0x780] ss:$8 sps:$4 sm:$0xff]  }
  0xfb   :  { %2139 = vmatprep.subr.bf16.mxu0 %v3081_v35  ;;  %v411_v35 = vsub.s32 1, %v406_v24  ;;  %v3207_v24 = vld [vmem:[#allocation5 + $0x8a4] ss:$8 sps:$4 sm:$0xff]  }
  0xfc   :  { %2179 = vmatpush1.bf16.msra.mxu1 %v3076_v36  ;;  %v85_v36 = vld [vmem:[#allocation2 + $0x70] sm:$0xff] }
  0xfd   :  { %2180 = vmatprep.subr.bf16.mxu1 %v3084_v37  ;;  %v102_v37 = vpack.c.bf16 %v83_v30, %v83_v30  ;;  %v87_v30 = vld [vmem:[#allocation2 + $0x80] sm:$0xff] }
  0xfe   :  { %2140 = vmatpush1.bf16.msra.mxu0 %v3079_v38  ;;  %v3204_v38 = vld [vmem:[#allocation5 + $0x924] ss:$8 sps:$4 sm:$0xff]  }
  0xff   :  { %2141 = vmatprep.subr.bf16.mxu0 %v3087_v39  ;;  %v408_v39 = vrot.slane %v403_v31, %v407_v29  ;;  %v3217_v29 = vld [vmem:[#allocation5 + $0x880] ss:$8 sps:$4 sm:$0xff]  }
 0x100   :  { %2181 = vmatpush1.bf16.msra.mxu1 %v3082_v40  ;;  %v3163_v40 = vld [vmem:[#allocation5 + $0x870] ss:$8 sps:$4 sm:$0xff]  }
 0x101   :  { %2182 = vmatprep.subr.bf16.mxu1 %v3090_v41  ;;  %v107_v41 = vpack.c.bf16 %v88_v33, %v88_v33 }
 0x102   :  { %2142 = vmatpush1.bf16.msra.mxu0 %v3085_v42  ;;  %v104_v42 = vpack.c.bf16 %v85_v36, %v85_v36 }
 0x103   :  { %2143 = vmatprep.subr.bf16.mxu0 %v3093_v43  ;;  %v3168_v43 = vld [vmem:[#allocation5 + $0x864] ss:$8 sps:$4 sm:$0xff]  }
 0x104   :  { %2183 = vmatpush1.bf16.msra.mxu1 %v3088_v44  ;;  %v412_v44 = vrot.slane %v403_v31, %v411_v35  ;;  %v106_v31 = vpack.c.bf16 %v87_v30, %v87_v30 }
 0x105   :  { %2184 = vmatprep.subr.bf16.mxu1 %v3096_v45  ;;  %v3202_v45 = vld [vmem:[#allocation5 + $0x920] ss:$8 sps:$4 sm:$0xff]  }
 0x106   :  { %2144 = vmatpush1.bf16.msra.mxu0 %v3091_v46 }
 0x107   :  { %2145 = vmatprep.subr.bf16.mxu0 %v3099_v47  ;;  %v3210_v47 = vld [vmem:[#allocation5 + $0x914] ss:$8 sps:$4 sm:$0xff]  }
 0x108   :  { %2185 = vmatpush1.bf16.msra.mxu1 %v3094_v48 }
 0x109   :  { %2186 = vmatprep.subr.bf16.mxu1 %v3102_v49  ;;  %v3166_v49 = vld [vmem:[#allocation5 + $0x860] ss:$8 sps:$4 sm:$0xff]  }
 0x10a   :  { %2146 = vmatpush1.bf16.msra.mxu0 %v3097_v50 }
 0x10b   :  { %2147 = vmatprep.subr.bf16.mxu0 %v3105_v51 }
 0x10c   :  { %2187 = vmatpush1.bf16.msra.mxu1 %v3100_v52  ;;  %v3171_v52 = vld [vmem:[#allocation5 + $0x854] ss:$8 sps:$4 sm:$0xff]  }
 0x10d   :  { %2188 = vmatprep.subr.bf16.mxu1 %v3108_v53 }
 0x10e   :  { %2148 = vmatpush1.bf16.msra.mxu0 %v3103_v54 }
 0x10f   :  { %2149 = vmatprep.subr.bf16.mxu0 %v3111_v55  ;;  %v3208_v55 = vld [vmem:[#allocation5 + $0x910] ss:$8 sps:$4 sm:$0xff]  }
 0x110   :  { %2189 = vmatpush1.bf16.msra.mxu1 %v3106_v56  ;;  %v3338_v56 = vmov 0  }
 0x111   :  { %2190 = vmatprep.subr.bf16.mxu1 %v3114_v57 }
 0x112   :  { %2150 = vmatpush1.bf16.msra.mxu0 %v3109_v58 }
 0x113   :  { %2151 = vmatprep.subr.bf16.mxu0 %v3117_v59  ;;  %v3216_v59 = vld [vmem:[#allocation5 + $0x904] ss:$8 sps:$4 sm:$0xff]  }
 0x114   :  { %2191 = vmatpush1.bf16.msra.mxu1 %v3112_v60 }
 0x115   :  { %2192 = vmatprep.subr.bf16.mxu1 %v3120_v61  ;;  %v3169_v61 = vld [vmem:[#allocation5 + $0x850] ss:$8 sps:$4 sm:$0xff]  }
 0x116   :  { %2152 = vmatpush2.bf16.msra.mxu0 %v3115_v62 }
 0x117   :  { %2153 = vmatprep.subr.bf16.mxu0 %v3123_v63  ;;  %v3174_v63 = vld [vmem:[#allocation5 + $0x844] ss:$8 sps:$4 sm:$0xff]  }
 0x118   :  { %2193 = vmatpush2.bf16.msra.mxu1 %v3118_v0 }
 0x119   :  { %2194 = vmatprep.subr.bf16.mxu1 %v3126_v1  ;;  %v3214_v1 = vld [vmem:[#allocation5 + $0x900] ss:$8 sps:$4 sm:$0xff]  }
 0x11a   :  { %2154 = vmatpush2.bf16.msra.mxu0 %v3121_v2  ;;  %v89_v2 = vld [vmem:[#allocation2 + $0x90] sm:$0xff] }
 0x11b   :  { %2155 = vmatprep.subr.bf16.mxu0 %v3129_v3 }
 0x11c   :  { %2195 = vmatpush2.bf16.msra.mxu1 %v3124_v4  ;;  %v3172_v4 = vld [vmem:[#allocation5 + $0x840] ss:$8 sps:$4 sm:$0xff]  }
 0x11d   :  { %2196 = vmatprep.subr.bf16.mxu1 %v3132_v5  ;;  %v3177_v5 = vld [vmem:[#allocation5 + $0x834] ss:$8 sps:$4 sm:$0xff]  }
 0x11e   :  { %2156 = vmatpush2.bf16.msra.mxu0 %v3127_v6  ;;  %v108_v6 = vpack.c.bf16 %v89_v2, %v89_v2  ;;  %v2321_v2 = vld [vmem:[%s3493_s3 + $0xa0] sm:$0xff] }
 0x11f   :  { %2157 = vmatprep.subr.bf16.mxu0 %v3135_v7  ;;  %v3175_v7 = vld [vmem:[#allocation5 + $0x830] ss:$8 sps:$4 sm:$0xff]  }
 0x120   :  { %2197 = vmatpush2.bf16.msra.mxu1 %v3130_v8  ;;  %v3180_v8 = vld [vmem:[#allocation5 + $0x824] ss:$8 sps:$4 sm:$0xff]  }
 0x121   :  { %2198 = vmatprep.subr.bf16.mxu1 %v3138_v9  ;;  %v3178_v9 = vld [vmem:[#allocation5 + $0x820] ss:$8 sps:$4 sm:$0xff]  }
 0x122   :  { %2158 = vmatpush2.bf16.msra.mxu0 %v3133_v10  ;;  %v3183_v10 = vld [vmem:[#allocation5 + $0x814] ss:$8 sps:$4 sm:$0xff]  }
 0x123   :  { %2159 = vmatprep.subr.bf16.mxu0 %v3141_v11  ;;  %v3181_v11 = vld [vmem:[#allocation5 + $0x810] ss:$8 sps:$4 sm:$0xff]  }
 0x124   :  { %2199 = vmatpush2.bf16.msra.mxu1 %v3136_v12  ;;  %v3186_v12 = vld [vmem:[#allocation5 + $0x804] ss:$8 sps:$4 sm:$0xff]  }
 0x125   :  { %2200 = vmatprep.subr.bf16.mxu1 %v3144_v13  ;;  %v3184_v13 = vld [vmem:[#allocation5 + $0x800] ss:$8 sps:$4 sm:$0xff]  }
 0x126   :  { %2160 = vmatpush2.bf16.msra.mxu0 %v3139_v14  ;;  %v3189_v14 = vld [vmem:[#allocation5 + $0x8f4] ss:$8 sps:$4 sm:$0xff]  }
 0x127   :  { %2161 = vmatprep.subr.bf16.mxu0 %v3147_v15  ;;  %v3187_v15 = vld [vmem:[#allocation5 + $0x8f0] ss:$8 sps:$4 sm:$0xff]  }
 0x128   :  { %2201 = vmatpush2.bf16.msra.mxu1 %v3142_v16  ;;  %v3192_v16 = vld [vmem:[#allocation5 + $0x8e4] ss:$8 sps:$4 sm:$0xff]  }
 0x129   :  { %2202 = vmatprep.subr.bf16.mxu1 %v3150_v17  ;;  %v3190_v17 = vld [vmem:[#allocation5 + $0x8e0] ss:$8 sps:$4 sm:$0xff]  }
 0x12a   :  { %2162 = vmatpush2.bf16.msra.mxu0 %v3145_v18  ;;  %v3195_v18 = vld [vmem:[#allocation5 + $0x8d4] ss:$8 sps:$4 sm:$0xff]  }
 0x12b   :  { %2163 = vmatprep.subr.bf16.mxu0 %v3153_v20  ;;  %v3198_v20 = vld [vmem:[#allocation5 + $0x8c4] ss:$8 sps:$4 sm:$0xff]  }
 0x12c   :  { %2203 = vmatpush2.bf16.msra.mxu1 %v3148_v21  ;;  %v3196_v21 = vld [vmem:[#allocation5 + $0x8c0] ss:$8 sps:$4 sm:$0xff]  }
 0x12d   :  { %2204 = vmatprep.subr.bf16.mxu1 %v3156_v22  ;;  %v3201_v22 = vld [vmem:[#allocation5 + $0x8b4] ss:$8 sps:$4 sm:$0xff]  }
 0x12e   :  { %2164 = vmatpush2.bf16.msra.mxu0 %v3151_v23  ;;  %v3199_v23 = vld [vmem:[#allocation5 + $0x8b0] ss:$8 sps:$4 sm:$0xff]  }
 0x12f   :  { %2165 = vmatprep.subr.bf16.mxu0 %v3159_v25  ;;  %v3205_v25 = vld [vmem:[#allocation5 + $0x8a0] ss:$8 sps:$4 sm:$0xff]  }
 0x130   :  { %2205 = vmatpush2.bf16.msra.mxu1 %v3154_v26  ;;  %v3213_v26 = vld [vmem:[#allocation5 + $0x894] ss:$8 sps:$4 sm:$0xff]  }
 0x131   :  { %2206 = vmatprep.subr.bf16.mxu1 %v3162_v27  ;;  %v3211_v27 = vld [vmem:[#allocation5 + $0x890] ss:$8 sps:$4 sm:$0xff]  }
 0x132   :  { %2166 = vmatpush2.bf16.msra.mxu0 %v3157_v28  ;;  %v3219_v28 = vld [vmem:[#allocation5 + $0x884] ss:$8 sps:$4 sm:$0xff]  }
 0x133   :  { %2217 = vmatprep.subr.bf16.mxu0 %v3165_v32 }
 0x134   :  { %2207 = vmatpush2.bf16.msra.mxu1 %v3160_v34 }
 0x135   :  { %v1923_v46 = vpop.f32.mrf.mxu0  ;;  %2168 = vmatmul.mubr.bf16.vlgmr.msra.gmra.mxu0 %v102_v37  ;;  %2268 = vmatprep.subr.bf16.mxu1 %v3204_v38 }
 0x136   :  { %v1924_v48 = vadd.f32 %v1923_v46, %v408_v39  ;;  %2218 = vmatpush1.bf16.msra.mxu0 %v3163_v40  ;;  %2249 = vmatprep.mubr.bf16.mxu0 %v107_v41  ;;  %v1964_v51 = vpop.f32.mrf.mxu1  ;;  %v2315_v46 = vld [vmem:[%s3493_s3 + $0x70] sm:$0xff] }
 0x137   :  { %v1925_v50 = vpop.f32.mrf.mxu0  ;;  %2209 = vmatmul.mubr.bf16.vlgmr.msra.gmra.mxu1 %v104_v42  ;;  %2219 = vmatprep.subr.bf16.mxu0 %v3168_v43  ;;  %v2332_v43 = vld [vmem:[%s3493_s3 + $0xf8] sm:$0xff] }
 0x138   :  { %v1926_v53 = vadd.f32 %v1925_v50, %v412_v44  ;;  %v3382_v54 = vadd.f32 %v1964_v51, %v1924_v48  ;;  %2269 = vmatpush1.bf16.msra.mxu1 %v3202_v45  ;;  %2290 = vmatprep.mubr.bf16.mxu1 %v3338_v56  ;;  %v1966_v58 = vpop.f32.mrf.mxu1  ;;  %v2316_v44 = vld [vmem:[%s3493_s3 + $0x78] sm:$0xff]  ;;  %v2331_v45 = vld [vmem:[%s3493_s3 + $0xf0] sm:$0xff]  ;;  %v2330_v48 = vld [vmem:[%s3493_s3 + $0xe8] sm:$0xff] }
 0x139   :  { %v1927_v57 = vpop.f32.mrf.mxu0  ;;  %2270 = vmatprep.subr.bf16.mxu1 %v3210_v47  ;;  %v2329_v50 = vld [vmem:[%s3493_s3 + $0xe0] sm:$0xff]  ;;  %v2326_v56 = vld [vmem:[%s3493_s3 + $0xc8] sm:$0xff] }
 0x13a   :  { %v3384_v60 = vadd.f32 %v1966_v58, %v1926_v53  ;;  %2220 = vmatpush1.bf16.msra.mxu0 %v3166_v49  ;;  %v1968_v0 = vpop.f32.mrf.mxu1  ;;  %v2314_v49 = vld [vmem:[%s3493_s3 + $0x68] sm:$0xff]  ;;  %v2313_v51 = vld [vmem:[%s3493_s3 + $0x60] sm:$0xff]  ;;  %v2312_v53 = vld [vmem:[%s3493_s3 + $0x58] sm:$0xff] }
 0x13b   :  { %v1928_v62 = vpop.f32.mrf.mxu0  ;;  %2221 = vmatprep.subr.bf16.mxu0 %v3171_v52  ;;  %v2328_v52 = vld [vmem:[%s3493_s3 + $0xd8] sm:$0xff]  ;;  %v2310_v57 = vld [vmem:[%s3493_s3 + $0x48] sm:$0xff]  ;;  %v2325_v58 = vld [vmem:[%s3493_s3 + $0xc0] sm:$0xff] }
 0x13c   :  { %2271 = vmatpush1.bf16.msra.mxu1 %v3208_v55  ;;  %v1969_v3 = vpop.f32.mrf.mxu1  ;;  %v2311_v55 = vld [vmem:[%s3493_s3 + $0x50] sm:$0xff]  ;;  %v2322_v0 = vld [vmem:[%s3493_s3 + $0xa8] sm:$0xff] }
 0x13d   :  { %2272 = vmatprep.subr.bf16.mxu1 %v3216_v59  ;;  %v2309_v59 = vld [vmem:[%s3493_s3 + $0x40] sm:$0xff]  ;;  %v2323_v62 = vld [vmem:[%s3493_s3 + $0xb0] sm:$0xff] }
 0x13e   :  { %2222 = vmatpush1.bf16.msra.mxu0 %v3169_v61  ;;  %v2308_v61 = vld [vmem:[%s3493_s3 + $0x38] sm:$0xff] }
 0x13f   :  { %2223 = vmatprep.subr.bf16.mxu0 %v3174_v63  ;;  %v2307_v63 = vld [vmem:[%s3493_s3 + $0x30] sm:$0xff] }
 0x140   :  { %2273 = vmatpush1.bf16.msra.mxu1 %v3214_v1  ;;  %v2306_v1 = vld [vmem:[%s3493_s3 + $0x28] sm:$0xff] }
 0x141   :  { %2736 = vmatprep.subr.mxu1 %v2332_v43 }
 0x142   :  { %2224 = vmatpush1.bf16.msra.mxu0 %v3172_v4  ;;  %v2305_v4 = vld [vmem:[%s3493_s3 + $0x20] sm:$0xff] }
 0x143   :  { %2225 = vmatprep.subr.bf16.mxu0 %v3177_v5  ;;  %2734 = vmatmul.mubr.msk.bf16.vlgmr.msra.gmra.mxu1 %vm1885_vm0, %v108_v6  ;;  %v2320_v6 = vld [vmem:[%s3493_s3 + $0x98] sm:$0xff] }
 0x144   :  { %2737 = vmatpush3.msra.mxu1 %v2316_v44 }
 0x145   :  { %2738 = vmatprep.subr.mxu1 %v2331_v45 }
 0x146   :  { %2226 = vmatpush1.bf16.msra.mxu0 %v3175_v7  ;;  %2739 = vmatpush3.msra.mxu1 %v2315_v46 }
 0x147   :  { %2227 = vmatprep.subr.bf16.mxu0 %v3180_v8  ;;  %2740 = vmatprep.subr.mxu1 %v2330_v48 }
 0x148   :  { %2741 = vmatpush3.msra.mxu1 %v2314_v49 }
 0x149   :  { %2742 = vmatprep.subr.mxu1 %v2329_v50 }
 0x14a   :  { %2228 = vmatpush1.bf16.msra.mxu0 %v3178_v9  ;;  %2743 = vmatpush3.msra.mxu1 %v2313_v51  ;;  %v2304_v9 = vld [vmem:[%s3493_s3 + $0x18] sm:$0xff] }
 0x14b   :  { %2229 = vmatprep.subr.bf16.mxu0 %v3183_v10  ;;  %2744 = vmatprep.subr.mxu1 %v2328_v52  ;;  %v2735_v52 = vld [vmem:[#allocation8] ss:$0 sm:$0xff] }
 0x14c   :  { %2745 = vmatpush3.msra.mxu1 %v2312_v53 }
 0x14e   :  { %2230 = vmatpush1.bf16.msra.mxu0 %v3181_v11 }
 0x14f   :  { %2231 = vmatprep.subr.bf16.mxu0 %v3186_v12  ;;  %v2319_v12 = vld [vmem:[%s3493_s3 + $0x90] sm:$0xff] }
 0x152   :  { %2232 = vmatpush1.bf16.msra.mxu0 %v3184_v13 }
 0x153   :  { %2233 = vmatprep.subr.bf16.mxu0 %v3189_v14 }
 0x156   :  { %2234 = vmatpush2.bf16.msra.mxu0 %v3187_v15  ;;  %v2303_v15 = vld [vmem:[%s3493_s3 + $0x10] sm:$0xff] }
 0x157   :  { %2235 = vmatprep.subr.bf16.mxu0 %v3192_v16 }
 0x15a   :  { %2236 = vmatpush2.bf16.msra.mxu0 %v3190_v17  ;;  %v2318_v17 = vld [vmem:[%s3493_s3 + $0x88] sm:$0xff] }
 0x15b   :  { %2237 = vmatprep.subr.bf16.mxu0 %v3195_v18 }
 0x15e   :  { %2238 = vmatpush2.bf16.msra.mxu0 %v3193_v19 }
 0x15f   :  { %2239 = vmatprep.subr.bf16.mxu0 %v3198_v20  ;;  %v2302_v20 = vld [vmem:[%s3493_s3 + $0x8] sm:$0xff] }
 0x162   :  { %2240 = vmatpush2.bf16.msra.mxu0 %v3196_v21  ;;  %v2317_v21 = vld [vmem:[%s3493_s3 + $0x80] sm:$0xff] }
 0x163   :  { %2241 = vmatprep.subr.bf16.mxu0 %v3201_v22  ;;  %v2301_v22 = vld [vmem:[%s3493_s3] sm:$0xff] }
 0x166   :  { %2242 = vmatpush2.bf16.msra.mxu0 %v3199_v23 }
 0x167   :  { %2243 = vmatprep.subr.bf16.mxu0 %v3207_v24 }
 0x16a   :  { %2244 = vmatpush2.bf16.msra.mxu0 %v3205_v25 }
 0x16b   :  { %2245 = vmatprep.subr.bf16.mxu0 %v3213_v26 }
 0x16e   :  { %2246 = vmatpush2.bf16.msra.mxu0 %v3211_v27 }
 0x16f   :  { %2247 = vmatprep.subr.bf16.mxu0 %v3219_v28 }
 0x172   :  { %2248 = vmatpush2.bf16.msra.mxu0 %v3217_v29 }
 0x175   :  { %v2005_v32 = vpop.f32.mrf.mxu0  ;;  %2250 = vmatmul.mubr.bf16.vlgmr.msra.gmra.mxu0 %v106_v31 }
 0x176   :  { %v2006_v33 = vadd.f32 %v2005_v32, %v3382_v54  ;;  %v2046_v35 = vpop.f32.mrf.mxu1  ;;  %v2327_v54 = vld [vmem:[%s3493_s3 + $0xd0] sm:$0xff] }
 0x177   :  { %v2007_v34 = vpop.f32.mrf.mxu0  ;;  %2746 = vmatprep.subr.mxu1 %v2327_v54 }
 0x178   :  { %v2008_v36 = vadd.f32 %v2007_v34, %v3384_v60  ;;  %v2047_v37 = vadd.f32 %v2046_v35, %v2006_v33  ;;  %v2048_v39 = vpop.f32.mrf.mxu1  ;;  %2747 = vmatpush3.msra.mxu1 %v2311_v55  ;;  %v2324_v60 = vld [vmem:[%s3493_s3 + $0xb8] sm:$0xff]  ;;  %s3339_s3 = smov [#allocation10]  }
 0x179   :  { %v2009_v38 = vpop.f32.mrf.mxu0  ;;  %2748 = vmatprep.subr.mxu1 %v2326_v56  ;;  %s2429_s18 = sshll.u32 %s3339_s3, 4  ;;  %s2430_s18 = int_to_ptr.vmem [resolvable:$true] %s2429_s18 }
 0x17a   :  { %v2049_v40 = vadd.f32 %v2048_v39, %v2008_v36  ;;  %v2050_v42 = vpop.f32.mrf.mxu1  ;;  %2749 = vmatpush3.msra.mxu1 %v2310_v57  ;;  %s3304_s19 = scalar_lea.vmem %s2430_s18, 128  ;;  %p3309_p7 = scmp.lt.s32.totalorder %s2430_s18, %s2430_s18 }
 0x17b   :  { %v2010_v41 = vpop.f32.mrf.mxu0  ;;  %2750 = vmatprep.subr.mxu1 %v2325_v58  ;;  %p3305_p6 = scmp.ne.s32.totalorder %s2430_s18, %s3304_s19  ;;  %p3310_p8 = scmp.lt.s32.totalorder %s3304_s19, %s3304_s19 }
 0x17c   :  { %v2051_v47 = vpop.f32.mrf.mxu1  ;;  %2751 = vmatpush3.msra.mxu1 %v2309_v59 }
 0x17d   :  { %2752 = vmatprep.subr.mxu1 %v2324_v60  ;;  %p3311_p9 = por %p3310_p8, %p3309_p7 }
 0x17e   :  { %2753 = vmatpush3.msra.mxu1 %v2308_v61 }
 0x17f   :  { %2754 = vmatprep.subr.mxu1 %v2323_v62  ;;  %p3312_p10 = pnand %p3311_p9, %p3305_p6 }
 0x180   :  { %2755 = vmatpush3.msra.mxu1 %v2307_v63 }
 0x181   :  { %2756 = vmatprep.subr.mxu1 %v2322_v0 }
 0x182   :  { %2757 = vmatpush3.msra.mxu1 %v2306_v1 }
 0x183   :  { %2758 = vmatprep.subr.mxu1 %v2321_v2 }
 0x184   :  { %2759 = vmatpush3.msra.mxu1 %v2305_v4 }
 0x185   :  { %2760 = vmatprep.subr.mxu1 %v2320_v6 }
 0x186   :  { %2761 = vmatpush3.msra.mxu1 %v2304_v9 }
 0x187   :  { %2762 = vmatprep.subr.mxu1 %v2319_v12 }
 0x188   :  { %2763 = vmatpush3.msra.mxu1 %v2303_v15 }
 0x189   :  { %2764 = vmatprep.subr.mxu1 %v2318_v17 }
 0x18a   :  { %2765 = vmatpush3.msra.mxu1 %v2302_v20 }
 0x18b   :  { %2766 = vmatprep.subr.mxu1 %v2317_v21 }
 0x18c   :  { %2767 = vmatpush3.msra.mxu1 %v2301_v22 }
 0x1b5   :  { %v2087_v3 = vpop.f32.mrf.mxu0 }
 0x1b6   :  { %v2088_v5 = vadd.f32 %v2087_v3, %v2047_v37 }
 0x1b7   :  { %v2089_v7 = vpop.f32.mrf.mxu0  ;;  %v2128_v8 = vpop.f32.mrf.mxu1 }
 0x1b8   :  { %v2090_v10 = vadd.f32 %v2089_v7, %v2049_v40  ;;  %v2129_v11 = vadd.f32 %v2128_v8, %v2088_v5 }
 0x1b9   :  { %v2091_v13 = vpop.f32.mrf.mxu0  ;;  %v2130_v14 = vpop.f32.mrf.mxu1 }
 0x1ba   :  { %v2131_v16 = vadd.f32 %v2130_v14, %v2090_v10 }
 0x1bb   :  { %v2092_v18 = vpop.f32.mrf.mxu0  ;;  %v2132_v19 = vpop.f32.mrf.mxu1 }
 0x1bd   :  { %v2133_v23 = vpop.f32.mrf.mxu1 }
 0x1f5   :  { %v2169_v24 = vpop.f32.mrf.mxu0 }
 0x1f6   :  { %v2170_v36 = vadd.f32 %v2169_v24, %v2129_v11 }
 0x1f7   :  { %v2171_v25 = vpop.f32.mrf.mxu0  ;;  %v2210_v26 = vpop.f32.mrf.mxu1 }
 0x1f8   :  { %v2172_v37 = vadd.f32 %v2171_v25, %v2131_v16  ;;  %v2211_v38 = vadd.f32 %v2210_v26, %v2170_v36 }
 0x1f9   :  { %v2173_v27 = vpop.f32.mrf.mxu0  ;;  %v2212_v28 = vpop.f32.mrf.mxu1 }
 0x1fa   :  { %v2213_v40 = vadd.f32 %v2212_v28, %v2172_v37 }
 0x1fb   :  { %v2174_v29 = vpop.f32.mrf.mxu0  ;;  %v2214_v30 = vpop.f32.mrf.mxu1 }
 0x1fd   :  { %v2215_v31 = vpop.f32.mrf.mxu1 }
 0x203   :  { %v2292_v32 = vpop.f32.mrf.mxu1 }
 0x205   :  { %v2294_v33 = vpop.f32.mrf.mxu1 }
 0x207   :  { %v2296_v34 = vpop.f32.mrf.mxu1 }
 0x209   :  { %v2297_v35 = vpop.f32.mrf.mxu1 }
 0x235   :  { %v2251_v39 = vpop.f32.mrf.mxu0 }
 0x236   :  { %v2252_v41 = vadd.f32 %v2251_v39, %v2211_v38 }
 0x237   :  { %v2253_v42 = vpop.f32.mrf.mxu0 }
 0x238   :  { %v2254_v43 = vadd.f32 %v2253_v42, %v2213_v40  ;;  %v2293_v44 = vadd.f32 %v2292_v32, %v2252_v41 }
 0x239   :  { %v2255_v45 = vpop.f32.mrf.mxu0 }
 0x23a   :  { %v2295_v46 = vadd.f32 %v2294_v33, %v2254_v43  ;;  %v2299_v49 = vmax.f32 %v2293_v44, 0.0 }
 0x23b   :  { %v2256_v47 = vpop.f32.mrf.mxu0 }
 0x23c   :  { %v2300_v48 = vmax.f32 %v2295_v46, 0.0 }
 0x23e   :  { %2404 = vmatprep.mubr.f32.mxu1 %v2300_v48 }
 0x23f   :  { %2405 = vmatmul.mubr.f32.vlgmr.msra.gmra.mxu1 %v2299_v49 }
 0x2ff   :  { %v2768_v50 = vpop.f32.mrf.mxu1 }
 0x301   :  { %v2769_v51 = vpop.f32.mrf.mxu1 }
 0x302   :  { %v2770_v53 = vadd.f32 %v2769_v51, %v2768_v50 }
 0x304   :  { %v2407_v54 = vadd.f32 %v2770_v53, %v2735_v52 }
 0x306   :  { %v2411_v55 = vsel %vm2410_vm1, %v2407_v54, -inf }
 0x307   :  { %2412 = vmax.xlane.f32.xlu0 %v2411_v55 }
 0x390   :  { %v2413_v56 = vpop.xlane.xlu0 %2412 }
 0x391   :  { %v2414_v57 = vsub.f32 %v2407_v54, %v2413_v56 }
 0x393   :  { %v2415_v58 = vmul.f32 1.442695, %v2414_v57 }
 0x395   :  { %3220 = vpow2.f32 %v2415_v58 }
 0x3a2   :  { %v3221_v59 = vpop.eup %3220 }
 0x3a3   :  { %v2417_v60 = vsel %vm2410_vm1, %v3221_v59, 0.0 }
 0x3a4   :  { %2418 = vadd.xlane.f32.xlu0 %v2417_v60 }
 0x42d   :  { %v2419_v61 = vpop.xlane.xlu0 %2418 }
 0x42e   :  { %3222 = vrcp.f32 %v2419_v61 }
 0x43b   :  { %v3223_v62 = vpop.eup %3222 }
 0x43c   :  { %v2421_v63 = vmul.f32 %v3223_v62, %v3221_v59 }
 0x43e   :  { %2422 = vst.msk [vmem:[#allocation10] sm:$0xff] %vm2410_vm1, %v2421_v63 }
 0x43f   :  { %3315 = shalt.err (!%p3312_p10)
}
 0x440   :  { %2432 = dma.vmem_to_hbm [thread:$0]  %s2430_s18, 128, %s3495_s5, [#allocation4]  }
 0x441   :  { %3330 = dma.done.wait [#allocation4], 128  }
 0x442   :  { %3331 = vsyncadd [#allocation4], 4294967168 }
 0x443   :  { %2436 = vsyncpa [#allocation3], 1 }
 0x444   :  { %2437 = vsyncpa [#allocation6], 1 }
 0x445   :  { %2438 = vsyncpa [#allocation9], 1 }
 0x446   :  { %2439 = vsyncpa [#allocation4], 1 }

</bundles_post_ra>
